<compile_context>
chip_gen: v7x
topology: tpu7x:2x2x1
jax: 0.10.0
libtpu: 0.0.40
codegen_flags: <defaults>
</compile_context>

<pallas_src>
import math

import jax
import jax.numpy as jnp
from jax import lax
from jax.experimental import pallas as pl
from jax.experimental.pallas import tpu as pltpu

# ---- TaskAlignedAssigner hyper-parameters (from __init__) ----
TOPK = 13
NUM_CLASSES = 16
ALPHA = 1.0
BETA = 6.0
EPS = 1e-9          # assigner eps
IOU_EPS = 1e-7      # bbox_iou eps


def _ipow(x, p):
    """x ** p for a static exponent; square-and-multiply for integer p (beta=6 -> 3 muls)."""
    if float(p) == 1.0:
        return x
    if float(p) == float(int(p)) and int(p) >= 1:
        e = int(p)
        result = None
        base = x
        while e:
            if e & 1:
                result = base if result is None else result * base
            e >>= 1
            if e:
                base = base * base
        return result
    return jnp.power(x, p)


# --------------------------------------------------------------------------------------
# Fused kernel (one grid step per batch element):
#   mask_in_gts -> bbox_scores gather -> CIoU -> align metric -> top-k ->
#   select_highest_overlaps -> get_targets -> score normalization.
# --------------------------------------------------------------------------------------
def _tal_kernel(pd_scores_ref, pdb_ref, anc_ref, gt_ref,
                tb_ref, ts_ref, misc_ref):
    ps = pd_scores_ref[0]          # (A, C)
    pdb = pdb_ref[0]               # (5, A) : x1, y1, x2, y2, atan(w/h)
    anc = anc_ref[...]             # (2, A)
    gt = gt_ref[0]                 # (n, 8) : x1, y1, x2, y2, label, atan(w/h), mask_gt, pad

    A, C = ps.shape
    n = gt.shape[0]

    ax = anc[0:1, :]               # (1, A)
    ay = anc[1:2, :]

    b1x1 = gt[:, 0:1]              # (n, 1) gt box coords
    b1y1 = gt[:, 1:2]
    b1x2 = gt[:, 2:3]
    b1y2 = gt[:, 3:4]
    labels = gt[:, 4:5].astype(jnp.int32)   # (n, 1)
    atan_gt = gt[:, 5:6]
    mgt = gt[:, 6:7]                        # (n, 1) float mask

    b2x1 = pdb[0:1, :]             # (1, A) predicted box coords
    b2y1 = pdb[1:2, :]
    b2x2 = pdb[2:3, :]
    b2y2 = pdb[3:4, :]
    atan_pd = pdb[4:5, :]

    # ---- select_candidates_in_gts ----
    d_l = ax - b1x1
    d_t = ay - b1y1
    d_r = b1x2 - ax
    d_b = b1y2 - ay
    min_delta = jnp.minimum(jnp.minimum(d_l, d_t), jnp.minimum(d_r, d_b))    # (n, A)
    mask_in = (min_delta > EPS).astype(jnp.float32)
    mask = mask_in * mgt                      # mask_in_gts * mask_gt
    mask_b = mask > 0.0

    # ---- bbox_scores = pd_scores[:, :, gt_label] via one-hot matmul (MXU) ----
    iota_nc = lax.broadcasted_iota(jnp.int32, (n, C), 1)
    onehot_nc = (iota_nc == labels).astype(jnp.float32)                       # (n, C)
    bbox_scores = lax.dot_general(onehot_nc, ps, (((1,), (1,)), ((), ())),
                                  preferred_element_type=jnp.float32)         # (n, A)
    bbox_scores = jnp.where(mask_b, bbox_scores, 0.0)

    # ---- CIoU (bbox_iou, xywh=False, CIoU=True), box1 = gt, box2 = pred ----
    w1 = b1x2 - b1x1
    h1 = b1y2 - b1y1 + IOU_EPS
    w2 = b2x2 - b2x1
    h2 = b2y2 - b2y1 + IOU_EPS
    inter = jnp.maximum(jnp.minimum(b1x2, b2x2) - jnp.maximum(b1x1, b2x1), 0.0) * \
            jnp.maximum(jnp.minimum(b1y2, b2y2) - jnp.maximum(b1y1, b2y1), 0.0)
    union = w1 * h1 + w2 * h2 - inter + IOU_EPS
    iou = inter / union
    cw = jnp.maximum(b1x2, b2x2) - jnp.minimum(b1x1, b2x1)
    ch = jnp.maximum(b1y2, b2y2) - jnp.minimum(b1y1, b2y1)
    c2 = cw * cw + ch * ch + IOU_EPS
    dx = b2x1 + b2x2 - b1x1 - b1x2
    dy = b2y1 + b2y2 - b1y1 - b1y2
    rho2 = (dx * dx + dy * dy) * 0.25
    dth = atan_pd - atan_gt
    v = (4.0 / (math.pi ** 2)) * (dth * dth)
    alpha_c = v / (v - iou + (1.0 + IOU_EPS))
    ciou = iou - (rho2 / c2 + v * alpha_c)
    ov = jnp.where(mask_b, jnp.maximum(ciou, 0.0), 0.0)                        # overlaps (n, A)

    # ---- task-aligned metric: s^alpha * u^beta (beta=6 -> square-and-multiply) ----
    am = _ipow(bbox_scores, ALPHA) * _ipow(ov, BETA)                           # (n, A)

    # ---- select_topk_candidates: in-kernel iterative max-and-exclude (K static) ----
    neg_inf = jnp.float32(-jnp.inf)
    iota_a = lax.broadcasted_iota(jnp.int32, (n, A), 1)
    work = am
    mask_topk = jnp.zeros((n, A), jnp.float32)
    for _ in range(TOPK):
        row_max = jnp.max(work, axis=1, keepdims=True)                         # (n, 1)
        first_idx = jnp.min(jnp.where(work == row_max, iota_a, A),
                            axis=1, keepdims=True)                             # (n, 1) first tie
        hit = (iota_a == first_idx)
        mask_topk = mask_topk + hit.astype(jnp.float32)
        work = jnp.where(hit, neg_inf, work)
    # invalid-gt rows are killed by the `* mgt` below (torch: masked_fill + count>1 -> 0)
    mask_pos = mask_topk * mask                                                # (n, A)

    # ---- select_highest_overlaps ----
    fg = jnp.sum(mask_pos, axis=0, keepdims=True)                              # (1, A)
    iota_n = lax.broadcasted_iota(jnp.int32, (n, A), 0)
    max_ov = jnp.max(ov, axis=0, keepdims=True)
    argmax_ov = jnp.min(jnp.where(ov == max_ov, iota_n, n), axis=0, keepdims=True)
    is_max = (iota_n == argmax_ov).astype(jnp.float32)
    mask_pos = jnp.where(fg > 1.0, is_max, mask_pos)
    fg = jnp.sum(mask_pos, axis=0, keepdims=True)                              # (1, A)

    max_mp = jnp.max(mask_pos, axis=0, keepdims=True)
    tgt_idx = jnp.min(jnp.where(mask_pos == max_mp, iota_n, n),
                      axis=0, keepdims=True)                                   # (1, A) argmax(-2)

    # ---- get_targets (lane-dense, no transposes / tiny matmuls) ----
    sel = (iota_n == tgt_idx)                                                  # (n, A) one gt/anchor
    sel_f = sel.astype(jnp.float32)

    target_labels = jnp.sum(jnp.where(sel, labels, 0), axis=0, keepdims=True)  # (1, A)
    target_labels = jnp.maximum(target_labels, 0)

    tb = jnp.concatenate([
        jnp.sum(sel_f * b1x1, axis=0, keepdims=True),
        jnp.sum(sel_f * b1y1, axis=0, keepdims=True),
        jnp.sum(sel_f * b1x2, axis=0, keepdims=True),
        jnp.sum(sel_f * b1y2, axis=0, keepdims=True)], axis=0)                 # (4, A)

    # ---- forward tail: align-metric normalization of target_scores ----
    am_pos = am * mask_pos
    pos_am = jnp.max(am_pos, axis=1, keepdims=True)                            # (n, 1)
    pos_ov = jnp.max(ov * mask_pos, axis=1, keepdims=True)                     # (n, 1)
    norm = jnp.max(am_pos * pos_ov / (pos_am + EPS), axis=0, keepdims=True)    # (1, A)

    sel_norm = jnp.where(fg > 0.0, norm, 0.0)                                  # (1, A)
    iota_ca = lax.broadcasted_iota(jnp.int32, (C, A), 0)
    target_scores = jnp.where(iota_ca == target_labels, sel_norm, 0.0)         # (C, A) lane-dense

    tb_ref[0] = tb
    ts_ref[0] = target_scores
    misc_ref[0] = jnp.concatenate(
        [fg.astype(jnp.int32), target_labels, tgt_idx], axis=0)                # (3, A) int32


# --------------------------------------------------------------------------------------
# Wrapper
# --------------------------------------------------------------------------------------
def task_aligned_assigner(pd_scores, pd_bboxes, anc_points, gt_labels, gt_bboxes, mask_gt):
    bs, A, C = pd_scores.shape
    n = gt_bboxes.shape[1]

    # torch parity: n_max_boxes == 0 early return (background everywhere).
    if n == 0:
        bg_idx = NUM_CLASSES
        return (jnp.full((bs, A), bg_idx, jnp.int32),
                jnp.zeros((bs, A, 4), jnp.float32),
                jnp.zeros((bs, A, C), jnp.float32),
                jnp.zeros((bs, A), jnp.bool_),
                jnp.zeros((bs, A), jnp.int32))

    pd_scores = pd_scores.astype(jnp.float32)
    pd_bboxes = pd_bboxes.astype(jnp.float32)
    gt_bboxes = gt_bboxes.astype(jnp.float32)

    # glue: transposed (lane-dense) layouts + per-box arctan terms of the CIoU aspect-ratio penalty
    # TODO(synk): arctan has no guaranteed Mosaic lowering; the per-box O(b*(n+A)) atan terms
    # are precomputed here and broadcast-combined inside the kernel.
    atan_pd = jnp.arctan((pd_bboxes[..., 2] - pd_bboxes[..., 0]) /
                         (pd_bboxes[..., 3] - pd_bboxes[..., 1] + IOU_EPS))        # (bs, A)
    pdb5 = jnp.concatenate([jnp.transpose(pd_bboxes, (0, 2, 1)),
                            atan_pd[:, None, :]], axis=1)                          # (bs, 5, A)
    anc_t = jnp.transpose(anc_points.astype(jnp.float32), (1, 0))                  # (2, A)

    atan_gt = jnp.arctan((gt_bboxes[..., 2] - gt_bboxes[..., 0]) /
                         (gt_bboxes[..., 3] - gt_bboxes[..., 1] + IOU_EPS))        # (bs, n)
    gt_pack = jnp.concatenate([
        gt_bboxes,                                                                  # coords
        gt_labels.astype(jnp.float32).reshape(bs, n, 1),                            # label
        atan_gt[..., None],                                                         # atan(w/h)
        mask_gt.astype(jnp.float32).reshape(bs, n, 1),                              # mask_gt
        jnp.zeros((bs, n, 1), jnp.float32)], axis=-1)                               # (bs, n, 8)

    bmap3 = lambda b: (b, 0, 0)

    # TODO(synk): for production YOLO shapes (A~8400, large n) add an anchor-tile grid axis
    # (two-pass top-k / normalization) so both v7x TensorCores stay busy and per-step VMEM is
    # bounded; at these shapes a single per-batch step fits easily in VMEM.
    tb, ts, misc = pl.pallas_call(
        _tal_kernel,
        out_shape=[
            jax.ShapeDtypeStruct((bs, 4, A), jnp.float32),   # target_bboxes (transposed)
            jax.ShapeDtypeStruct((bs, C, A), jnp.float32),   # target_scores (transposed)
            jax.ShapeDtypeStruct((bs, 3, A), jnp.int32),     # [fg_count, target_labels, target_gt_idx]
        ],
        grid_spec=pltpu.PrefetchScalarGridSpec(
            num_scalar_prefetch=0,
            grid=(bs,),
            in_specs=[
                pl.BlockSpec((1, A, C), bmap3),              # pd_scores
                pl.BlockSpec((1, 5, A), bmap3),              # pred boxes + atan (transposed)
                pl.BlockSpec((2, A), lambda b: (0, 0)),      # anchor centers (transposed)
                pl.BlockSpec((1, n, 8), bmap3),              # packed per-gt side inputs
            ],
            out_specs=[
                pl.BlockSpec((1, 4, A), bmap3),
                pl.BlockSpec((1, C, A), bmap3),
                pl.BlockSpec((1, 3, A), bmap3),
            ],
        ),
        compiler_params=pltpu.CompilerParams(
            dimension_semantics=("parallel",),
            vmem_limit_bytes=32 * 1024 * 1024,               # explicit budget (v7x-safe)
        ),
    )(pd_scores, pdb5, anc_t, gt_pack)

    target_bboxes = jnp.transpose(tb, (0, 2, 1))             # (bs, A, 4)
    target_scores = jnp.transpose(ts, (0, 2, 1))             # (bs, A, C)
    fg_mask = misc[:, 0, :] > 0                              # (bs, A) bool
    target_labels = misc[:, 1, :]                            # (bs, A) int32
    target_gt_idx = misc[:, 2, :]                            # (bs, A) int32
    return target_labels, target_bboxes, target_scores, fg_mask, target_gt_idx


if __name__ == "__main__":
    key = jax.random.PRNGKey(0)
    k1, k2, k3, k4, k5 = jax.random.split(key, 5)

    bs, side, C, n = 2, 16, NUM_CLASSES, 8
    A = side * side                                              # 256 anchors

    # predicted class scores (sigmoid-like, in (0,1))
    pd_scores = jax.random.uniform(k1, (bs, A, C), jnp.float32)

    # anchor centers on a 16x16 grid (stride 1, +0.5 offset)
    xs = jnp.arange(side, dtype=jnp.float32) + 0.5
    gy, gx = jnp.meshgrid(xs, xs, indexing="ij")
    anc_points = jnp.stack([gx.reshape(-1), gy.reshape(-1)], axis=-1)   # (A, 2)

    # predicted boxes (xyxy) around anchor centers
    off = jax.random.uniform(k2, (bs, A, 4), jnp.float32, 0.5, 3.0)
    pd_bboxes = jnp.stack(
        [anc_points[None, :, 0] - off[..., 0],
         anc_points[None, :, 1] - off[..., 1],
         anc_points[None, :, 0] + off[..., 2],
         anc_points[None, :, 1] + off[..., 3]], axis=-1)                # (bs, A, 4)

    # ground-truth boxes / labels, padded to n_max_boxes with zeros
    xy = jax.random.uniform(k3, (bs, n, 2), jnp.float32, 0.0, 12.0)
    wh = jax.random.uniform(k4, (bs, n, 2), jnp.float32, 1.5, 4.0)
    gt_bboxes = jnp.concatenate([xy, xy + wh], axis=-1)                 # (bs, n, 4)
    gt_labels = jax.random.randint(k5, (bs, n, 1), 0, C).astype(jnp.int32)
    mask_gt = jnp.array([[1, 1, 1, 1, 1, 0, 0, 0],
                         [1, 1, 1, 1, 1, 1, 1, 0]], jnp.float32)[..., None]
    gt_bboxes = gt_bboxes * mask_gt                                     # zero padded gts

    outs = task_aligned_assigner(pd_scores, pd_bboxes, anc_points,
                                 gt_labels, gt_bboxes, mask_gt)
    jax.block_until_ready(outs)
    print("KERNEL_OK")
</pallas_src>

<mosaic_0001>
module attributes {stable_mosaic.version = 11 : i64} {
  func.func @_tal_kernel(%arg0: i32, %arg1: memref<1x256x16xf32, #tpu.memory_space<vmem>>, %arg2: memref<1x5x256xf32, #tpu.memory_space<vmem>>, %arg3: memref<2x256xf32, #tpu.memory_space<vmem>>, %arg4: memref<1x8x8xf32, #tpu.memory_space<vmem>>, %arg5: memref<1x4x256xf32, #tpu.memory_space<vmem>>, %arg6: memref<1x16x256xf32, #tpu.memory_space<vmem>>, %arg7: memref<1x3x256xi32, #tpu.memory_space<vmem>>) attributes {dimension_semantics = [#tpu.dimension_semantics<parallel>], iteration_bounds = array<i64: 2>, scalar_prefetch = 0 : i64, scratch_operands = 0 : i64, tpu.core_type = #tpu.core_type<tc>, window_params = [{transform_indices = @transform_0, window_bounds = array<i64: 1, 256, 16>}, {transform_indices = @transform_1, window_bounds = array<i64: 1, 5, 256>}, {pipeline_mode = #tpu.pipeline_mode<synchronous>, transform_indices = @transform_2, window_bounds = array<i64: 2, 256>}, {transform_indices = @transform_3, window_bounds = array<i64: 1, 8, 8>}, {transform_indices = @transform_4, window_bounds = array<i64: 1, 4, 256>}, {transform_indices = @transform_5, window_bounds = array<i64: 1, 16, 256>}, {transform_indices = @transform_6, window_bounds = array<i64: 1, 3, 256>}]} {
    %c0 = arith.constant 0 : index
    %c0_0 = arith.constant 0 : index
    %c0_1 = arith.constant 0 : index
    %0 = vector.load %arg1[%c0, %c0_0, %c0_1] : memref<1x256x16xf32, #tpu.memory_space<vmem>>, vector<1x256x16xf32>
    %1 = vector.shape_cast %0 : vector<1x256x16xf32> to vector<256x16xf32>
    %c0_2 = arith.constant 0 : index
    %c0_3 = arith.constant 0 : index
    %c0_4 = arith.constant 0 : index
    %2 = vector.load %arg2[%c0_2, %c0_3, %c0_4] : memref<1x5x256xf32, #tpu.memory_space<vmem>>, vector<1x5x256xf32>
    %3 = vector.shape_cast %2 : vector<1x5x256xf32> to vector<5x256xf32>
    %c0_5 = arith.constant 0 : index
    %c0_6 = arith.constant 0 : index
    %4 = vector.load %arg3[%c0_5, %c0_6] : memref<2x256xf32, #tpu.memory_space<vmem>>, vector<2x256xf32>
    %c0_7 = arith.constant 0 : index
    %c0_8 = arith.constant 0 : index
    %c0_9 = arith.constant 0 : index
    %5 = vector.load %arg4[%c0_7, %c0_8, %c0_9] : memref<1x8x8xf32, #tpu.memory_space<vmem>>, vector<1x8x8xf32>
    %6 = vector.shape_cast %5 : vector<1x8x8xf32> to vector<8x8xf32>
    %7 = vector.extract_strided_slice %4 {offsets = [0, 0], sizes = [1, 256], strides = [1, 1]} : vector<2x256xf32> to vector<1x256xf32>
    %8 = vector.extract_strided_slice %4 {offsets = [1, 0], sizes = [1, 256], strides = [1, 1]} : vector<2x256xf32> to vector<1x256xf32>
    %9 = vector.extract_strided_slice %6 {offsets = [0, 0], sizes = [8, 1], strides = [1, 1]} : vector<8x8xf32> to vector<8x1xf32>
    %10 = vector.extract_strided_slice %6 {offsets = [0, 1], sizes = [8, 1], strides = [1, 1]} : vector<8x8xf32> to vector<8x1xf32>
    %11 = vector.extract_strided_slice %6 {offsets = [0, 2], sizes = [8, 1], strides = [1, 1]} : vector<8x8xf32> to vector<8x1xf32>
    %12 = vector.extract_strided_slice %6 {offsets = [0, 3], sizes = [8, 1], strides = [1, 1]} : vector<8x8xf32> to vector<8x1xf32>
    %13 = vector.extract_strided_slice %6 {offsets = [0, 4], sizes = [8, 1], strides = [1, 1]} : vector<8x8xf32> to vector<8x1xf32>
    %14 = arith.fptosi %13 : vector<8x1xf32> to vector<8x1xi32>
    %15 = vector.extract_strided_slice %6 {offsets = [0, 5], sizes = [8, 1], strides = [1, 1]} : vector<8x8xf32> to vector<8x1xf32>
    %16 = vector.extract_strided_slice %6 {offsets = [0, 6], sizes = [8, 1], strides = [1, 1]} : vector<8x8xf32> to vector<8x1xf32>
    %17 = vector.extract_strided_slice %3 {offsets = [0, 0], sizes = [1, 256], strides = [1, 1]} : vector<5x256xf32> to vector<1x256xf32>
    %18 = vector.extract_strided_slice %3 {offsets = [1, 0], sizes = [1, 256], strides = [1, 1]} : vector<5x256xf32> to vector<1x256xf32>
    %19 = vector.extract_strided_slice %3 {offsets = [2, 0], sizes = [1, 256], strides = [1, 1]} : vector<5x256xf32> to vector<1x256xf32>
    %20 = vector.extract_strided_slice %3 {offsets = [3, 0], sizes = [1, 256], strides = [1, 1]} : vector<5x256xf32> to vector<1x256xf32>
    %21 = vector.extract_strided_slice %3 {offsets = [4, 0], sizes = [1, 256], strides = [1, 1]} : vector<5x256xf32> to vector<1x256xf32>
    %22 = vector.broadcast %7 : vector<1x256xf32> to vector<8x256xf32>
    %23 = vector.broadcast %9 : vector<8x1xf32> to vector<8x256xf32>
    %24 = arith.subf %22, %23 : vector<8x256xf32>
    %25 = vector.broadcast %8 : vector<1x256xf32> to vector<8x256xf32>
    %26 = vector.broadcast %10 : vector<8x1xf32> to vector<8x256xf32>
    %27 = arith.subf %25, %26 : vector<8x256xf32>
    %28 = vector.broadcast %11 : vector<8x1xf32> to vector<8x256xf32>
    %29 = vector.broadcast %7 : vector<1x256xf32> to vector<8x256xf32>
    %30 = arith.subf %28, %29 : vector<8x256xf32>
    %31 = vector.broadcast %12 : vector<8x1xf32> to vector<8x256xf32>
    %32 = vector.broadcast %8 : vector<1x256xf32> to vector<8x256xf32>
    %33 = arith.subf %31, %32 : vector<8x256xf32>
    %34 = arith.minimumf %24, %27 : vector<8x256xf32>
    %35 = arith.minimumf %30, %33 : vector<8x256xf32>
    %36 = arith.minimumf %34, %35 : vector<8x256xf32>
    %cst = arith.constant 9.99999971E-10 : f32
    %37 = vector.broadcast %cst : f32 to vector<8x256xf32>
    %38 = arith.cmpf ogt, %36, %37 : vector<8x256xf32>
    %39 = arith.extui %38 : vector<8x256xi1> to vector<8x256xi32>
    %40 = arith.sitofp %39 : vector<8x256xi32> to vector<8x256xf32>
    %41 = vector.broadcast %16 : vector<8x1xf32> to vector<8x256xf32>
    %42 = arith.mulf %40, %41 : vector<8x256xf32>
    %cst_10 = arith.constant 0.000000e+00 : f32
    %43 = vector.broadcast %cst_10 : f32 to vector<8x256xf32>
    %44 = arith.cmpf ogt, %42, %43 : vector<8x256xf32>
    %45 = tpu.iota {dimensions = array<i32: 1>} : vector<8x16xi32>
    %46 = vector.broadcast %14 : vector<8x1xi32> to vector<8x16xi32>
    %47 = arith.cmpi eq, %45, %46 : vector<8x16xi32>
    %48 = arith.extui %47 : vector<8x16xi1> to vector<8x16xi32>
    %49 = arith.sitofp %48 : vector<8x16xi32> to vector<8x16xf32>
    %cst_11 = arith.constant dense<0.000000e+00> : vector<8x256xf32>
    %50 = tpu.matmul %49, %1, %cst_11 {dimension_numbers = #tpu.dot_dimension_numbers<[1], [1], [0], [0], [0, 0, 1, 0], [], []>} : vector<8x16xf32>, vector<256x16xf32>, vector<8x256xf32> -> vector<8x256xf32>
    %cst_12 = arith.constant 0.000000e+00 : f32
    %51 = vector.broadcast %cst_12 : f32 to vector<8x256xf32>
    %52 = arith.select %44, %50, %51 : vector<8x256xi1>, vector<8x256xf32>
    %53 = arith.subf %11, %9 : vector<8x1xf32>
    %54 = arith.subf %12, %10 : vector<8x1xf32>
    %cst_13 = arith.constant 1.000000e-07 : f32
    %55 = vector.broadcast %cst_13 : f32 to vector<8x1xf32>
    %56 = arith.addf %54, %55 : vector<8x1xf32>
    %57 = arith.subf %19, %17 : vector<1x256xf32>
    %58 = arith.subf %20, %18 : vector<1x256xf32>
    %cst_14 = arith.constant 1.000000e-07 : f32
    %59 = vector.broadcast %cst_14 : f32 to vector<1x256xf32>
    %60 = arith.addf %58, %59 : vector<1x256xf32>
    %61 = vector.broadcast %11 : vector<8x1xf32> to vector<8x256xf32>
    %62 = vector.broadcast %19 : vector<1x256xf32> to vector<8x256xf32>
    %63 = arith.minimumf %61, %62 : vector<8x256xf32>
    %64 = vector.broadcast %9 : vector<8x1xf32> to vector<8x256xf32>
    %65 = vector.broadcast %17 : vector<1x256xf32> to vector<8x256xf32>
    %66 = arith.maximumf %64, %65 : vector<8x256xf32>
    %67 = arith.subf %63, %66 : vector<8x256xf32>
    %cst_15 = arith.constant 0.000000e+00 : f32
    %68 = vector.broadcast %cst_15 : f32 to vector<8x256xf32>
    %69 = arith.maximumf %67, %68 : vector<8x256xf32>
    %70 = vector.broadcast %12 : vector<8x1xf32> to vector<8x256xf32>
    %71 = vector.broadcast %20 : vector<1x256xf32> to vector<8x256xf32>
    %72 = arith.minimumf %70, %71 : vector<8x256xf32>
    %73 = vector.broadcast %10 : vector<8x1xf32> to vector<8x256xf32>
    %74 = vector.broadcast %18 : vector<1x256xf32> to vector<8x256xf32>
    %75 = arith.maximumf %73, %74 : vector<8x256xf32>
    %76 = arith.subf %72, %75 : vector<8x256xf32>
    %cst_16 = arith.constant 0.000000e+00 : f32
    %77 = vector.broadcast %cst_16 : f32 to vector<8x256xf32>
    %78 = arith.maximumf %76, %77 : vector<8x256xf32>
    %79 = arith.mulf %69, %78 : vector<8x256xf32>
    %80 = arith.mulf %53, %56 : vector<8x1xf32>
    %81 = arith.mulf %57, %60 : vector<1x256xf32>
    %82 = vector.broadcast %80 : vector<8x1xf32> to vector<8x256xf32>
    %83 = vector.broadcast %81 : vector<1x256xf32> to vector<8x256xf32>
    %84 = arith.addf %82, %83 : vector<8x256xf32>
    %85 = arith.subf %84, %79 : vector<8x256xf32>
    %cst_17 = arith.constant 1.000000e-07 : f32
    %86 = vector.broadcast %cst_17 : f32 to vector<8x256xf32>
    %87 = arith.addf %85, %86 : vector<8x256xf32>
    %88 = arith.divf %79, %87 : vector<8x256xf32>
    %89 = vector.broadcast %11 : vector<8x1xf32> to vector<8x256xf32>
    %90 = vector.broadcast %19 : vector<1x256xf32> to vector<8x256xf32>
    %91 = arith.maximumf %89, %90 : vector<8x256xf32>
    %92 = vector.broadcast %9 : vector<8x1xf32> to vector<8x256xf32>
    %93 = vector.broadcast %17 : vector<1x256xf32> to vector<8x256xf32>
    %94 = arith.minimumf %92, %93 : vector<8x256xf32>
    %95 = arith.subf %91, %94 : vector<8x256xf32>
    %96 = vector.broadcast %12 : vector<8x1xf32> to vector<8x256xf32>
    %97 = vector.broadcast %20 : vector<1x256xf32> to vector<8x256xf32>
    %98 = arith.maximumf %96, %97 : vector<8x256xf32>
    %99 = vector.broadcast %10 : vector<8x1xf32> to vector<8x256xf32>
    %100 = vector.broadcast %18 : vector<1x256xf32> to vector<8x256xf32>
    %101 = arith.minimumf %99, %100 : vector<8x256xf32>
    %102 = arith.subf %98, %101 : vector<8x256xf32>
    %103 = arith.mulf %95, %95 : vector<8x256xf32>
    %104 = arith.mulf %102, %102 : vector<8x256xf32>
    %105 = arith.addf %103, %104 : vector<8x256xf32>
    %cst_18 = arith.constant 1.000000e-07 : f32
    %106 = vector.broadcast %cst_18 : f32 to vector<8x256xf32>
    %107 = arith.addf %105, %106 : vector<8x256xf32>
    %108 = arith.addf %17, %19 : vector<1x256xf32>
    %109 = vector.broadcast %108 : vector<1x256xf32> to vector<8x256xf32>
    %110 = vector.broadcast %9 : vector<8x1xf32> to vector<8x256xf32>
    %111 = arith.subf %109, %110 : vector<8x256xf32>
    %112 = vector.broadcast %11 : vector<8x1xf32> to vector<8x256xf32>
    %113 = arith.subf %111, %112 : vector<8x256xf32>
    %114 = arith.addf %18, %20 : vector<1x256xf32>
    %115 = vector.broadcast %114 : vector<1x256xf32> to vector<8x256xf32>
    %116 = vector.broadcast %10 : vector<8x1xf32> to vector<8x256xf32>
    %117 = arith.subf %115, %116 : vector<8x256xf32>
    %118 = vector.broadcast %12 : vector<8x1xf32> to vector<8x256xf32>
    %119 = arith.subf %117, %118 : vector<8x256xf32>
    %120 = arith.mulf %113, %113 : vector<8x256xf32>
    %121 = arith.mulf %119, %119 : vector<8x256xf32>
    %122 = arith.addf %120, %121 : vector<8x256xf32>
    %cst_19 = arith.constant 2.500000e-01 : f32
    %123 = vector.broadcast %cst_19 : f32 to vector<8x256xf32>
    %124 = arith.mulf %122, %123 : vector<8x256xf32>
    %125 = vector.broadcast %21 : vector<1x256xf32> to vector<8x256xf32>
    %126 = vector.broadcast %15 : vector<8x1xf32> to vector<8x256xf32>
    %127 = arith.subf %125, %126 : vector<8x256xf32>
    %128 = arith.mulf %127, %127 : vector<8x256xf32>
    %cst_20 = arith.constant 0.405284733 : f32
    %129 = vector.broadcast %cst_20 : f32 to vector<8x256xf32>
    %130 = arith.mulf %129, %128 : vector<8x256xf32>
    %131 = arith.subf %130, %88 : vector<8x256xf32>
    %cst_21 = arith.constant 1.00000012 : f32
    %132 = vector.broadcast %cst_21 : f32 to vector<8x256xf32>
    %133 = arith.addf %131, %132 : vector<8x256xf32>
    %134 = arith.divf %130, %133 : vector<8x256xf32>
    %135 = arith.divf %124, %107 : vector<8x256xf32>
    %136 = arith.mulf %130, %134 : vector<8x256xf32>
    %137 = arith.addf %135, %136 : vector<8x256xf32>
    %138 = arith.subf %88, %137 : vector<8x256xf32>
    %cst_22 = arith.constant 0.000000e+00 : f32
    %139 = vector.broadcast %cst_22 : f32 to vector<8x256xf32>
    %140 = arith.maximumf %138, %139 : vector<8x256xf32>
    %cst_23 = arith.constant 0.000000e+00 : f32
    %141 = vector.broadcast %cst_23 : f32 to vector<8x256xf32>
    %142 = arith.select %44, %140, %141 : vector<8x256xi1>, vector<8x256xf32>
    %143 = arith.mulf %142, %142 : vector<8x256xf32>
    %144 = arith.mulf %143, %143 : vector<8x256xf32>
    %145 = arith.mulf %143, %144 : vector<8x256xf32>
    %146 = arith.mulf %52, %145 : vector<8x256xf32>
    %147 = tpu.iota {dimensions = array<i32: 1>} : vector<8x256xi32>
    %cst_24 = arith.constant 0.000000e+00 : f32
    %148 = vector.broadcast %cst_24 : f32 to vector<8x256xf32>
    %cst_25 = arith.constant dense<0xFF800000> : vector<8xf32>
    %149 = vector.multi_reduction <maximumf>, %146, %cst_25 [1] : vector<8x256xf32> to vector<8xf32>
    %150 = vector.shape_cast %149 : vector<8xf32> to vector<8x1xf32>
    %151 = vector.broadcast %150 : vector<8x1xf32> to vector<8x256xf32>
    %152 = arith.cmpf oeq, %146, %151 : vector<8x256xf32>
    %c256_i32 = arith.constant 256 : i32
    %153 = vector.broadcast %c256_i32 : i32 to vector<8x256xi32>
    %154 = arith.select %152, %147, %153 : vector<8x256xi1>, vector<8x256xi32>
    %cst_26 = arith.constant dense<2147483647> : vector<8xi32>
    %155 = vector.multi_reduction <minsi>, %154, %cst_26 [1] : vector<8x256xi32> to vector<8xi32>
    %156 = vector.shape_cast %155 : vector<8xi32> to vector<8x1xi32>
    %157 = vector.broadcast %156 : vector<8x1xi32> to vector<8x256xi32>
    %158 = arith.cmpi eq, %147, %157 : vector<8x256xi32>
    %159 = arith.extui %158 : vector<8x256xi1> to vector<8x256xi32>
    %160 = arith.sitofp %159 : vector<8x256xi32> to vector<8x256xf32>
    %161 = arith.addf %148, %160 : vector<8x256xf32>
    %cst_27 = arith.constant 0xFF800000 : f32
    %162 = vector.broadcast %cst_27 : f32 to vector<8x256xf32>
    %163 = arith.select %158, %162, %146 : vector<8x256xi1>, vector<8x256xf32>
    %cst_28 = arith.constant dense<0xFF800000> : vector<8xf32>
    %164 = vector.multi_reduction <maximumf>, %163, %cst_28 [1] : vector<8x256xf32> to vector<8xf32>
    %165 = vector.shape_cast %164 : vector<8xf32> to vector<8x1xf32>
    %166 = vector.broadcast %165 : vector<8x1xf32> to vector<8x256xf32>
    %167 = arith.cmpf oeq, %163, %166 : vector<8x256xf32>
    %c256_i32_29 = arith.constant 256 : i32
    %168 = vector.broadcast %c256_i32_29 : i32 to vector<8x256xi32>
    %169 = arith.select %167, %147, %168 : vector<8x256xi1>, vector<8x256xi32>
    %cst_30 = arith.constant dense<2147483647> : vector<8xi32>
    %170 = vector.multi_reduction <minsi>, %169, %cst_30 [1] : vector<8x256xi32> to vector<8xi32>
    %171 = vector.shape_cast %170 : vector<8xi32> to vector<8x1xi32>
    %172 = vector.broadcast %171 : vector<8x1xi32> to vector<8x256xi32>
    %173 = arith.cmpi eq, %147, %172 : vector<8x256xi32>
    %174 = arith.extui %173 : vector<8x256xi1> to vector<8x256xi32>
    %175 = arith.sitofp %174 : vector<8x256xi32> to vector<8x256xf32>
    %176 = arith.addf %161, %175 : vector<8x256xf32>
    %cst_31 = arith.constant 0xFF800000 : f32
    %177 = vector.broadcast %cst_31 : f32 to vector<8x256xf32>
    %178 = arith.select %173, %177, %163 : vector<8x256xi1>, vector<8x256xf32>
    %cst_32 = arith.constant dense<0xFF800000> : vector<8xf32>
    %179 = vector.multi_reduction <maximumf>, %178, %cst_32 [1] : vector<8x256xf32> to vector<8xf32>
    %180 = vector.shape_cast %179 : vector<8xf32> to vector<8x1xf32>
    %181 = vector.broadcast %180 : vector<8x1xf32> to vector<8x256xf32>
    %182 = arith.cmpf oeq, %178, %181 : vector<8x256xf32>
    %c256_i32_33 = arith.constant 256 : i32
    %183 = vector.broadcast %c256_i32_33 : i32 to vector<8x256xi32>
    %184 = arith.select %182, %147, %183 : vector<8x256xi1>, vector<8x256xi32>
    %cst_34 = arith.constant dense<2147483647> : vector<8xi32>
    %185 = vector.multi_reduction <minsi>, %184, %cst_34 [1] : vector<8x256xi32> to vector<8xi32>
    %186 = vector.shape_cast %185 : vector<8xi32> to vector<8x1xi32>
    %187 = vector.broadcast %186 : vector<8x1xi32> to vector<8x256xi32>
    %188 = arith.cmpi eq, %147, %187 : vector<8x256xi32>
    %189 = arith.extui %188 : vector<8x256xi1> to vector<8x256xi32>
    %190 = arith.sitofp %189 : vector<8x256xi32> to vector<8x256xf32>
    %191 = arith.addf %176, %190 : vector<8x256xf32>
    %cst_35 = arith.constant 0xFF800000 : f32
    %192 = vector.broadcast %cst_35 : f32 to vector<8x256xf32>
    %193 = arith.select %188, %192, %178 : vector<8x256xi1>, vector<8x256xf32>
    %cst_36 = arith.constant dense<0xFF800000> : vector<8xf32>
    %194 = vector.multi_reduction <maximumf>, %193, %cst_36 [1] : vector<8x256xf32> to vector<8xf32>
    %195 = vector.shape_cast %194 : vector<8xf32> to vector<8x1xf32>
    %196 = vector.broadcast %195 : vector<8x1xf32> to vector<8x256xf32>
    %197 = arith.cmpf oeq, %193, %196 : vector<8x256xf32>
    %c256_i32_37 = arith.constant 256 : i32
    %198 = vector.broadcast %c256_i32_37 : i32 to vector<8x256xi32>
    %199 = arith.select %197, %147, %198 : vector<8x256xi1>, vector<8x256xi32>
    %cst_38 = arith.constant dense<2147483647> : vector<8xi32>
    %200 = vector.multi_reduction <minsi>, %199, %cst_38 [1] : vector<8x256xi32> to vector<8xi32>
    %201 = vector.shape_cast %200 : vector<8xi32> to vector<8x1xi32>
    %202 = vector.broadcast %201 : vector<8x1xi32> to vector<8x256xi32>
    %203 = arith.cmpi eq, %147, %202 : vector<8x256xi32>
    %204 = arith.extui %203 : vector<8x256xi1> to vector<8x256xi32>
    %205 = arith.sitofp %204 : vector<8x256xi32> to vector<8x256xf32>
    %206 = arith.addf %191, %205 : vector<8x256xf32>
    %cst_39 = arith.constant 0xFF800000 : f32
    %207 = vector.broadcast %cst_39 : f32 to vector<8x256xf32>
    %208 = arith.select %203, %207, %193 : vector<8x256xi1>, vector<8x256xf32>
    %cst_40 = arith.constant dense<0xFF800000> : vector<8xf32>
    %209 = vector.multi_reduction <maximumf>, %208, %cst_40 [1] : vector<8x256xf32> to vector<8xf32>
    %210 = vector.shape_cast %209 : vector<8xf32> to vector<8x1xf32>
    %211 = vector.broadcast %210 : vector<8x1xf32> to vector<8x256xf32>
    %212 = arith.cmpf oeq, %208, %211 : vector<8x256xf32>
    %c256_i32_41 = arith.constant 256 : i32
    %213 = vector.broadcast %c256_i32_41 : i32 to vector<8x256xi32>
    %214 = arith.select %212, %147, %213 : vector<8x256xi1>, vector<8x256xi32>
    %cst_42 = arith.constant dense<2147483647> : vector<8xi32>
    %215 = vector.multi_reduction <minsi>, %214, %cst_42 [1] : vector<8x256xi32> to vector<8xi32>
    %216 = vector.shape_cast %215 : vector<8xi32> to vector<8x1xi32>
    %217 = vector.broadcast %216 : vector<8x1xi32> to vector<8x256xi32>
    %218 = arith.cmpi eq, %147, %217 : vector<8x256xi32>
    %219 = arith.extui %218 : vector<8x256xi1> to vector<8x256xi32>
    %220 = arith.sitofp %219 : vector<8x256xi32> to vector<8x256xf32>
    %221 = arith.addf %206, %220 : vector<8x256xf32>
    %cst_43 = arith.constant 0xFF800000 : f32
    %222 = vector.broadcast %cst_43 : f32 to vector<8x256xf32>
    %223 = arith.select %218, %222, %208 : vector<8x256xi1>, vector<8x256xf32>
    %cst_44 = arith.constant dense<0xFF800000> : vector<8xf32>
    %224 = vector.multi_reduction <maximumf>, %223, %cst_44 [1] : vector<8x256xf32> to vector<8xf32>
    %225 = vector.shape_cast %224 : vector<8xf32> to vector<8x1xf32>
    %226 = vector.broadcast %225 : vector<8x1xf32> to vector<8x256xf32>
    %227 = arith.cmpf oeq, %223, %226 : vector<8x256xf32>
    %c256_i32_45 = arith.constant 256 : i32
    %228 = vector.broadcast %c256_i32_45 : i32 to vector<8x256xi32>
    %229 = arith.select %227, %147, %228 : vector<8x256xi1>, vector<8x256xi32>
    %cst_46 = arith.constant dense<2147483647> : vector<8xi32>
    %230 = vector.multi_reduction <minsi>, %229, %cst_46 [1] : vector<8x256xi32> to vector<8xi32>
    %231 = vector.shape_cast %230 : vector<8xi32> to vector<8x1xi32>
    %232 = vector.broadcast %231 : vector<8x1xi32> to vector<8x256xi32>
    %233 = arith.cmpi eq, %147, %232 : vector<8x256xi32>
    %234 = arith.extui %233 : vector<8x256xi1> to vector<8x256xi32>
    %235 = arith.sitofp %234 : vector<8x256xi32> to vector<8x256xf32>
    %236 = arith.addf %221, %235 : vector<8x256xf32>
    %cst_47 = arith.constant 0xFF800000 : f32
    %237 = vector.broadcast %cst_47 : f32 to vector<8x256xf32>
    %238 = arith.select %233, %237, %223 : vector<8x256xi1>, vector<8x256xf32>
    %cst_48 = arith.constant dense<0xFF800000> : vector<8xf32>
    %239 = vector.multi_reduction <maximumf>, %238, %cst_48 [1] : vector<8x256xf32> to vector<8xf32>
    %240 = vector.shape_cast %239 : vector<8xf32> to vector<8x1xf32>
    %241 = vector.broadcast %240 : vector<8x1xf32> to vector<8x256xf32>
    %242 = arith.cmpf oeq, %238, %241 : vector<8x256xf32>
    %c256_i32_49 = arith.constant 256 : i32
    %243 = vector.broadcast %c256_i32_49 : i32 to vector<8x256xi32>
    %244 = arith.select %242, %147, %243 : vector<8x256xi1>, vector<8x256xi32>
    %cst_50 = arith.constant dense<2147483647> : vector<8xi32>
    %245 = vector.multi_reduction <minsi>, %244, %cst_50 [1] : vector<8x256xi32> to vector<8xi32>
    %246 = vector.shape_cast %245 : vector<8xi32> to vector<8x1xi32>
    %247 = vector.broadcast %246 : vector<8x1xi32> to vector<8x256xi32>
    %248 = arith.cmpi eq, %147, %247 : vector<8x256xi32>
    %249 = arith.extui %248 : vector<8x256xi1> to vector<8x256xi32>
    %250 = arith.sitofp %249 : vector<8x256xi32> to vector<8x256xf32>
    %251 = arith.addf %236, %250 : vector<8x256xf32>
    %cst_51 = arith.constant 0xFF800000 : f32
    %252 = vector.broadcast %cst_51 : f32 to vector<8x256xf32>
    %253 = arith.select %248, %252, %238 : vector<8x256xi1>, vector<8x256xf32>
    %cst_52 = arith.constant dense<0xFF800000> : vector<8xf32>
    %254 = vector.multi_reduction <maximumf>, %253, %cst_52 [1] : vector<8x256xf32> to vector<8xf32>
    %255 = vector.shape_cast %254 : vector<8xf32> to vector<8x1xf32>
    %256 = vector.broadcast %255 : vector<8x1xf32> to vector<8x256xf32>
    %257 = arith.cmpf oeq, %253, %256 : vector<8x256xf32>
    %c256_i32_53 = arith.constant 256 : i32
    %258 = vector.broadcast %c256_i32_53 : i32 to vector<8x256xi32>
    %259 = arith.select %257, %147, %258 : vector<8x256xi1>, vector<8x256xi32>
    %cst_54 = arith.constant dense<2147483647> : vector<8xi32>
    %260 = vector.multi_reduction <minsi>, %259, %cst_54 [1] : vector<8x256xi32> to vector<8xi32>
    %261 = vector.shape_cast %260 : vector<8xi32> to vector<8x1xi32>
    %262 = vector.broadcast %261 : vector<8x1xi32> to vector<8x256xi32>
    %263 = arith.cmpi eq, %147, %262 : vector<8x256xi32>
    %264 = arith.extui %263 : vector<8x256xi1> to vector<8x256xi32>
    %265 = arith.sitofp %264 : vector<8x256xi32> to vector<8x256xf32>
    %266 = arith.addf %251, %265 : vector<8x256xf32>
    %cst_55 = arith.constant 0xFF800000 : f32
    %267 = vector.broadcast %cst_55 : f32 to vector<8x256xf32>
    %268 = arith.select %263, %267, %253 : vector<8x256xi1>, vector<8x256xf32>
    %cst_56 = arith.constant dense<0xFF800000> : vector<8xf32>
    %269 = vector.multi_reduction <maximumf>, %268, %cst_56 [1] : vector<8x256xf32> to vector<8xf32>
    %270 = vector.shape_cast %269 : vector<8xf32> to vector<8x1xf32>
    %271 = vector.broadcast %270 : vector<8x1xf32> to vector<8x256xf32>
    %272 = arith.cmpf oeq, %268, %271 : vector<8x256xf32>
    %c256_i32_57 = arith.constant 256 : i32
    %273 = vector.broadcast %c256_i32_57 : i32 to vector<8x256xi32>
    %274 = arith.select %272, %147, %273 : vector<8x256xi1>, vector<8x256xi32>
    %cst_58 = arith.constant dense<2147483647> : vector<8xi32>
    %275 = vector.multi_reduction <minsi>, %274, %cst_58 [1] : vector<8x256xi32> to vector<8xi32>
    %276 = vector.shape_cast %275 : vector<8xi32> to vector<8x1xi32>
    %277 = vector.broadcast %276 : vector<8x1xi32> to vector<8x256xi32>
    %278 = arith.cmpi eq, %147, %277 : vector<8x256xi32>
    %279 = arith.extui %278 : vector<8x256xi1> to vector<8x256xi32>
    %280 = arith.sitofp %279 : vector<8x256xi32> to vector<8x256xf32>
    %281 = arith.addf %266, %280 : vector<8x256xf32>
    %cst_59 = arith.constant 0xFF800000 : f32
    %282 = vector.broadcast %cst_59 : f32 to vector<8x256xf32>
    %283 = arith.select %278, %282, %268 : vector<8x256xi1>, vector<8x256xf32>
    %cst_60 = arith.constant dense<0xFF800000> : vector<8xf32>
    %284 = vector.multi_reduction <maximumf>, %283, %cst_60 [1] : vector<8x256xf32> to vector<8xf32>
    %285 = vector.shape_cast %284 : vector<8xf32> to vector<8x1xf32>
    %286 = vector.broadcast %285 : vector<8x1xf32> to vector<8x256xf32>
    %287 = arith.cmpf oeq, %283, %286 : vector<8x256xf32>
    %c256_i32_61 = arith.constant 256 : i32
    %288 = vector.broadcast %c256_i32_61 : i32 to vector<8x256xi32>
    %289 = arith.select %287, %147, %288 : vector<8x256xi1>, vector<8x256xi32>
    %cst_62 = arith.constant dense<2147483647> : vector<8xi32>
    %290 = vector.multi_reduction <minsi>, %289, %cst_62 [1] : vector<8x256xi32> to vector<8xi32>
    %291 = vector.shape_cast %290 : vector<8xi32> to vector<8x1xi32>
    %292 = vector.broadcast %291 : vector<8x1xi32> to vector<8x256xi32>
    %293 = arith.cmpi eq, %147, %292 : vector<8x256xi32>
    %294 = arith.extui %293 : vector<8x256xi1> to vector<8x256xi32>
    %295 = arith.sitofp %294 : vector<8x256xi32> to vector<8x256xf32>
    %296 = arith.addf %281, %295 : vector<8x256xf32>
    %cst_63 = arith.constant 0xFF800000 : f32
    %297 = vector.broadcast %cst_63 : f32 to vector<8x256xf32>
    %298 = arith.select %293, %297, %283 : vector<8x256xi1>, vector<8x256xf32>
    %cst_64 = arith.constant dense<0xFF800000> : vector<8xf32>
    %299 = vector.multi_reduction <maximumf>, %298, %cst_64 [1] : vector<8x256xf32> to vector<8xf32>
    %300 = vector.shape_cast %299 : vector<8xf32> to vector<8x1xf32>
    %301 = vector.broadcast %300 : vector<8x1xf32> to vector<8x256xf32>
    %302 = arith.cmpf oeq, %298, %301 : vector<8x256xf32>
    %c256_i32_65 = arith.constant 256 : i32
    %303 = vector.broadcast %c256_i32_65 : i32 to vector<8x256xi32>
    %304 = arith.select %302, %147, %303 : vector<8x256xi1>, vector<8x256xi32>
    %cst_66 = arith.constant dense<2147483647> : vector<8xi32>
    %305 = vector.multi_reduction <minsi>, %304, %cst_66 [1] : vector<8x256xi32> to vector<8xi32>
    %306 = vector.shape_cast %305 : vector<8xi32> to vector<8x1xi32>
    %307 = vector.broadcast %306 : vector<8x1xi32> to vector<8x256xi32>
    %308 = arith.cmpi eq, %147, %307 : vector<8x256xi32>
    %309 = arith.extui %308 : vector<8x256xi1> to vector<8x256xi32>
    %310 = arith.sitofp %309 : vector<8x256xi32> to vector<8x256xf32>
    %311 = arith.addf %296, %310 : vector<8x256xf32>
    %cst_67 = arith.constant 0xFF800000 : f32
    %312 = vector.broadcast %cst_67 : f32 to vector<8x256xf32>
    %313 = arith.select %308, %312, %298 : vector<8x256xi1>, vector<8x256xf32>
    %cst_68 = arith.constant dense<0xFF800000> : vector<8xf32>
    %314 = vector.multi_reduction <maximumf>, %313, %cst_68 [1] : vector<8x256xf32> to vector<8xf32>
    %315 = vector.shape_cast %314 : vector<8xf32> to vector<8x1xf32>
    %316 = vector.broadcast %315 : vector<8x1xf32> to vector<8x256xf32>
    %317 = arith.cmpf oeq, %313, %316 : vector<8x256xf32>
    %c256_i32_69 = arith.constant 256 : i32
    %318 = vector.broadcast %c256_i32_69 : i32 to vector<8x256xi32>
    %319 = arith.select %317, %147, %318 : vector<8x256xi1>, vector<8x256xi32>
    %cst_70 = arith.constant dense<2147483647> : vector<8xi32>
    %320 = vector.multi_reduction <minsi>, %319, %cst_70 [1] : vector<8x256xi32> to vector<8xi32>
    %321 = vector.shape_cast %320 : vector<8xi32> to vector<8x1xi32>
    %322 = vector.broadcast %321 : vector<8x1xi32> to vector<8x256xi32>
    %323 = arith.cmpi eq, %147, %322 : vector<8x256xi32>
    %324 = arith.extui %323 : vector<8x256xi1> to vector<8x256xi32>
    %325 = arith.sitofp %324 : vector<8x256xi32> to vector<8x256xf32>
    %326 = arith.addf %311, %325 : vector<8x256xf32>
    %cst_71 = arith.constant 0xFF800000 : f32
    %327 = vector.broadcast %cst_71 : f32 to vector<8x256xf32>
    %328 = arith.select %323, %327, %313 : vector<8x256xi1>, vector<8x256xf32>
    %cst_72 = arith.constant dense<0xFF800000> : vector<8xf32>
    %329 = vector.multi_reduction <maximumf>, %328, %cst_72 [1] : vector<8x256xf32> to vector<8xf32>
    %330 = vector.shape_cast %329 : vector<8xf32> to vector<8x1xf32>
    %331 = vector.broadcast %330 : vector<8x1xf32> to vector<8x256xf32>
    %332 = arith.cmpf oeq, %328, %331 : vector<8x256xf32>
    %c256_i32_73 = arith.constant 256 : i32
    %333 = vector.broadcast %c256_i32_73 : i32 to vector<8x256xi32>
    %334 = arith.select %332, %147, %333 : vector<8x256xi1>, vector<8x256xi32>
    %cst_74 = arith.constant dense<2147483647> : vector<8xi32>
    %335 = vector.multi_reduction <minsi>, %334, %cst_74 [1] : vector<8x256xi32> to vector<8xi32>
    %336 = vector.shape_cast %335 : vector<8xi32> to vector<8x1xi32>
    %337 = vector.broadcast %336 : vector<8x1xi32> to vector<8x256xi32>
    %338 = arith.cmpi eq, %147, %337 : vector<8x256xi32>
    %339 = arith.extui %338 : vector<8x256xi1> to vector<8x256xi32>
    %340 = arith.sitofp %339 : vector<8x256xi32> to vector<8x256xf32>
    %341 = arith.addf %326, %340 : vector<8x256xf32>
    %342 = arith.mulf %341, %42 : vector<8x256xf32>
    %cst_75 = arith.constant dense<0.000000e+00> : vector<256xf32>
    %343 = vector.multi_reduction <add>, %342, %cst_75 [0] : vector<8x256xf32> to vector<256xf32>
    %344 = vector.shape_cast %343 : vector<256xf32> to vector<1x256xf32>
    %345 = tpu.iota {dimensions = array<i32: 0>} : vector<8x256xi32>
    %cst_76 = arith.constant dense<0xFF800000> : vector<256xf32>
    %346 = vector.multi_reduction <maximumf>, %142, %cst_76 [0] : vector<8x256xf32> to vector<256xf32>
    %347 = vector.shape_cast %346 : vector<256xf32> to vector<1x256xf32>
    %348 = vector.broadcast %347 : vector<1x256xf32> to vector<8x256xf32>
    %349 = arith.cmpf oeq, %142, %348 : vector<8x256xf32>
    %c8_i32 = arith.constant 8 : i32
    %350 = vector.broadcast %c8_i32 : i32 to vector<8x256xi32>
    %351 = arith.select %349, %345, %350 : vector<8x256xi1>, vector<8x256xi32>
    %cst_77 = arith.constant dense<2147483647> : vector<256xi32>
    %352 = vector.multi_reduction <minsi>, %351, %cst_77 [0] : vector<8x256xi32> to vector<256xi32>
    %353 = vector.shape_cast %352 : vector<256xi32> to vector<1x256xi32>
    %354 = vector.broadcast %353 : vector<1x256xi32> to vector<8x256xi32>
    %355 = arith.cmpi eq, %345, %354 : vector<8x256xi32>
    %356 = arith.extui %355 : vector<8x256xi1> to vector<8x256xi32>
    %357 = arith.sitofp %356 : vector<8x256xi32> to vector<8x256xf32>
    %cst_78 = arith.constant 1.000000e+00 : f32
    %358 = vector.broadcast %cst_78 : f32 to vector<1x256xf32>
    %359 = arith.cmpf ogt, %344, %358 : vector<1x256xf32>
    %360 = vector.shape_cast %359 : vector<1x256xi1> to vector<1x256xi1>
    %361 = vector.broadcast %360 : vector<1x256xi1> to vector<8x256xi1>
    %362 = arith.select %361, %357, %342 : vector<8x256xi1>, vector<8x256xf32>
    %cst_79 = arith.constant dense<0.000000e+00> : vector<256xf32>
    %363 = vector.multi_reduction <add>, %362, %cst_79 [0] : vector<8x256xf32> to vector<256xf32>
    %364 = vector.shape_cast %363 : vector<256xf32> to vector<1x256xf32>
    %cst_80 = arith.constant dense<0xFF800000> : vector<256xf32>
    %365 = vector.multi_reduction <maximumf>, %362, %cst_80 [0] : vector<8x256xf32> to vector<256xf32>
    %366 = vector.shape_cast %365 : vector<256xf32> to vector<1x256xf32>
    %367 = vector.broadcast %366 : vector<1x256xf32> to vector<8x256xf32>
    %368 = arith.cmpf oeq, %362, %367 : vector<8x256xf32>
    %c8_i32_81 = arith.constant 8 : i32
    %369 = vector.broadcast %c8_i32_81 : i32 to vector<8x256xi32>
    %370 = arith.select %368, %345, %369 : vector<8x256xi1>, vector<8x256xi32>
    %cst_82 = arith.constant dense<2147483647> : vector<256xi32>
    %371 = vector.multi_reduction <minsi>, %370, %cst_82 [0] : vector<8x256xi32> to vector<256xi32>
    %372 = vector.shape_cast %371 : vector<256xi32> to vector<1x256xi32>
    %373 = vector.broadcast %372 : vector<1x256xi32> to vector<8x256xi32>
    %374 = arith.cmpi eq, %345, %373 : vector<8x256xi32>
    %375 = arith.extui %374 : vector<8x256xi1> to vector<8x256xi32>
    %376 = arith.sitofp %375 : vector<8x256xi32> to vector<8x256xf32>
    %c0_i32 = arith.constant 0 : i32
    %377 = vector.shape_cast %14 : vector<8x1xi32> to vector<8x1xi32>
    %378 = vector.broadcast %377 : vector<8x1xi32> to vector<8x256xi32>
    %379 = vector.broadcast %c0_i32 : i32 to vector<8x256xi32>
    %380 = arith.select %374, %378, %379 : vector<8x256xi1>, vector<8x256xi32>
    %cst_83 = arith.constant dense<0> : vector<256xi32>
    %381 = vector.multi_reduction <add>, %380, %cst_83 [0] : vector<8x256xi32> to vector<256xi32>
    %382 = vector.shape_cast %381 : vector<256xi32> to vector<1x256xi32>
    %c0_i32_84 = arith.constant 0 : i32
    %383 = vector.broadcast %c0_i32_84 : i32 to vector<1x256xi32>
    %384 = arith.maxsi %382, %383 : vector<1x256xi32>
    %385 = vector.broadcast %9 : vector<8x1xf32> to vector<8x256xf32>
    %386 = arith.mulf %376, %385 : vector<8x256xf32>
    %cst_85 = arith.constant dense<0.000000e+00> : vector<256xf32>
    %387 = vector.multi_reduction <add>, %386, %cst_85 [0] : vector<8x256xf32> to vector<256xf32>
    %388 = vector.shape_cast %387 : vector<256xf32> to vector<1x256xf32>
    %389 = vector.broadcast %10 : vector<8x1xf32> to vector<8x256xf32>
    %390 = arith.mulf %376, %389 : vector<8x256xf32>
    %cst_86 = arith.constant dense<0.000000e+00> : vector<256xf32>
    %391 = vector.multi_reduction <add>, %390, %cst_86 [0] : vector<8x256xf32> to vector<256xf32>
    %392 = vector.shape_cast %391 : vector<256xf32> to vector<1x256xf32>
    %393 = vector.broadcast %11 : vector<8x1xf32> to vector<8x256xf32>
    %394 = arith.mulf %376, %393 : vector<8x256xf32>
    %cst_87 = arith.constant dense<0.000000e+00> : vector<256xf32>
    %395 = vector.multi_reduction <add>, %394, %cst_87 [0] : vector<8x256xf32> to vector<256xf32>
    %396 = vector.shape_cast %395 : vector<256xf32> to vector<1x256xf32>
    %397 = vector.broadcast %12 : vector<8x1xf32> to vector<8x256xf32>
    %398 = arith.mulf %376, %397 : vector<8x256xf32>
    %cst_88 = arith.constant dense<0.000000e+00> : vector<256xf32>
    %399 = vector.multi_reduction <add>, %398, %cst_88 [0] : vector<8x256xf32> to vector<256xf32>
    %400 = vector.shape_cast %399 : vector<256xf32> to vector<1x256xf32>
    %401 = tpu.concatenate %388, %392, %396, %400 in 0 : vector<1x256xf32>, vector<1x256xf32>, vector<1x256xf32>, vector<1x256xf32> -> vector<4x256xf32>
    %402 = arith.mulf %146, %362 : vector<8x256xf32>
    %cst_89 = arith.constant dense<0xFF800000> : vector<8xf32>
    %403 = vector.multi_reduction <maximumf>, %402, %cst_89 [1] : vector<8x256xf32> to vector<8xf32>
    %404 = vector.shape_cast %403 : vector<8xf32> to vector<8x1xf32>
    %405 = arith.mulf %142, %362 : vector<8x256xf32>
    %cst_90 = arith.constant dense<0xFF800000> : vector<8xf32>
    %406 = vector.multi_reduction <maximumf>, %405, %cst_90 [1] : vector<8x256xf32> to vector<8xf32>
    %407 = vector.shape_cast %406 : vector<8xf32> to vector<8x1xf32>
    %408 = vector.broadcast %407 : vector<8x1xf32> to vector<8x256xf32>
    %409 = arith.mulf %402, %408 : vector<8x256xf32>
    %cst_91 = arith.constant 9.99999971E-10 : f32
    %410 = vector.broadcast %cst_91 : f32 to vector<8x1xf32>
    %411 = arith.addf %404, %410 : vector<8x1xf32>
    %412 = vector.broadcast %411 : vector<8x1xf32> to vector<8x256xf32>
    %413 = arith.divf %409, %412 : vector<8x256xf32>
    %cst_92 = arith.constant dense<0xFF800000> : vector<256xf32>
    %414 = vector.multi_reduction <maximumf>, %413, %cst_92 [0] : vector<8x256xf32> to vector<256xf32>
    %415 = vector.shape_cast %414 : vector<256xf32> to vector<1x256xf32>
    %cst_93 = arith.constant 0.000000e+00 : f32
    %416 = vector.broadcast %cst_93 : f32 to vector<1x256xf32>
    %417 = arith.cmpf ogt, %364, %416 : vector<1x256xf32>
    %cst_94 = arith.constant 0.000000e+00 : f32
    %418 = vector.broadcast %cst_94 : f32 to vector<1x256xf32>
    %419 = arith.select %417, %415, %418 : vector<1x256xi1>, vector<1x256xf32>
    %420 = tpu.iota {dimensions = array<i32: 0>} : vector<16x256xi32>
    %421 = vector.broadcast %384 : vector<1x256xi32> to vector<16x256xi32>
    %422 = arith.cmpi eq, %420, %421 : vector<16x256xi32>
    %cst_95 = arith.constant 0.000000e+00 : f32
    %423 = vector.shape_cast %419 : vector<1x256xf32> to vector<1x256xf32>
    %424 = vector.broadcast %423 : vector<1x256xf32> to vector<16x256xf32>
    %425 = vector.broadcast %cst_95 : f32 to vector<16x256xf32>
    %426 = arith.select %422, %424, %425 : vector<16x256xi1>, vector<16x256xf32>
    %c0_96 = arith.constant 0 : index
    %c0_97 = arith.constant 0 : index
    %c0_98 = arith.constant 0 : index
    %427 = vector.load %arg5[%c0_96, %c0_97, %c0_98] : memref<1x4x256xf32, #tpu.memory_space<vmem>>, vector<1x4x256xf32>
    %428 = vector.shape_cast %427 : vector<1x4x256xf32> to vector<4x256xf32>
    %429 = vector.shape_cast %401 : vector<4x256xf32> to vector<1x4x256xf32>
    tpu.vector_store %arg5[%c0_96, %c0_97, %c0_98], %429 {strides = array<i32>} : memref<1x4x256xf32, #tpu.memory_space<vmem>>, vector<1x4x256xf32>,
    %c0_99 = arith.constant 0 : index
    %c0_100 = arith.constant 0 : index
    %c0_101 = arith.constant 0 : index
    %430 = vector.load %arg6[%c0_99, %c0_100, %c0_101] : memref<1x16x256xf32, #tpu.memory_space<vmem>>, vector<1x16x256xf32>
    %431 = vector.shape_cast %430 : vector<1x16x256xf32> to vector<16x256xf32>
    %432 = vector.shape_cast %426 : vector<16x256xf32> to vector<1x16x256xf32>
    tpu.vector_store %arg6[%c0_99, %c0_100, %c0_101], %432 {strides = array<i32>} : memref<1x16x256xf32, #tpu.memory_space<vmem>>, vector<1x16x256xf32>,
    %433 = arith.fptosi %364 : vector<1x256xf32> to vector<1x256xi32>
    %434 = tpu.concatenate %433, %384, %372 in 0 : vector<1x256xi32>, vector<1x256xi32>, vector<1x256xi32> -> vector<3x256xi32>
    %c0_102 = arith.constant 0 : index
    %c0_103 = arith.constant 0 : index
    %c0_104 = arith.constant 0 : index
    %435 = vector.load %arg7[%c0_102, %c0_103, %c0_104] : memref<1x3x256xi32, #tpu.memory_space<vmem>>, vector<1x3x256xi32>
    %436 = vector.shape_cast %435 : vector<1x3x256xi32> to vector<3x256xi32>
    %437 = vector.shape_cast %434 : vector<3x256xi32> to vector<1x3x256xi32>
    tpu.vector_store %arg7[%c0_102, %c0_103, %c0_104], %437 {strides = array<i32>} : memref<1x3x256xi32, #tpu.memory_space<vmem>>, vector<1x3x256xi32>,
    return
  }
  func.func @transform_0(%arg0: i32) -> (i32, i32, i32) {
    %c0_i32 = arith.constant 0 : i32
    %c0_i32_0 = arith.constant 0 : i32
    %c0_i32_1 = arith.constant 0 : i32
    return %arg0, %c0_i32, %c0_i32_0 : i32, i32, i32
  }
  func.func @transform_1(%arg0: i32) -> (i32, i32, i32) {
    %c0_i32 = arith.constant 0 : i32
    %c0_i32_0 = arith.constant 0 : i32
    %c0_i32_1 = arith.constant 0 : i32
    return %arg0, %c0_i32, %c0_i32_0 : i32, i32, i32
  }
  func.func @transform_2(%arg0: i32) -> (i32, i32) {
    %c0_i32 = arith.constant 0 : i32
    %c0_i32_0 = arith.constant 0 : i32
    %c0_i32_1 = arith.constant 0 : i32
    return %c0_i32, %c0_i32_0 : i32, i32
  }
  func.func @transform_3(%arg0: i32) -> (i32, i32, i32) {
    %c0_i32 = arith.constant 0 : i32
    %c0_i32_0 = arith.constant 0 : i32
    %c0_i32_1 = arith.constant 0 : i32
    return %arg0, %c0_i32, %c0_i32_0 : i32, i32, i32
  }
  func.func @transform_4(%arg0: i32) -> (i32, i32, i32) {
    %c0_i32 = arith.constant 0 : i32
    %c0_i32_0 = arith.constant 0 : i32
    %c0_i32_1 = arith.constant 0 : i32
    return %arg0, %c0_i32, %c0_i32_0 : i32, i32, i32
  }
  func.func @transform_5(%arg0: i32) -> (i32, i32, i32) {
    %c0_i32 = arith.constant 0 : i32
    %c0_i32_0 = arith.constant 0 : i32
    %c0_i32_1 = arith.constant 0 : i32
    return %arg0, %c0_i32, %c0_i32_0 : i32, i32, i32
  }
  func.func @transform_6(%arg0: i32) -> (i32, i32, i32) {
    %c0_i32 = arith.constant 0 : i32
    %c0_i32_0 = arith.constant 0 : i32
    %c0_i32_1 = arith.constant 0 : i32
    return %arg0, %c0_i32, %c0_i32_0 : i32, i32, i32
  }
}

</mosaic_0001>

<bundles_post_ra>
// kernel: tpu_custom_call.1
= control target key start
LH: loop header
LB: loop body
LE: loop exit
PB: predicated region body
PF: predicated region fallthrough
CT: control target
= control target key end

     0   :  { %12 = vsyncpa [#allocation3], 0  ;;  %s2639_s0 = inlined_call_operand.vmem [shape: f32[2,256,16], index: 0, kind: input, shape index: {}]   ;;  %s2640_s1 = inlined_call_operand.vmem [shape: f32[2,5,256], index: 1, kind: input, shape index: {}]   ;;  %s2641_s2 = inlined_call_operand.vmem [shape: f32[2,256], index: 2, kind: input, shape index: {}]   ;;  %s2642_s3 = inlined_call_operand.vmem [shape: f32[2,8,8], index: 3, kind: input, shape index: {}]   ;;  %s2643_s4 = inlined_call_operand.hbm [shape: f32[2,4,256], index: 4, kind: output, shape index: {0}]   ;;  %s2644_s5 = inlined_call_operand.hbm [shape: f32[2,16,256], index: 5, kind: output, shape index: {1}]   ;;  %s2645_s6 = inlined_call_operand.vmem [shape: s32[2,3,256], index: 6, kind: output, shape index: {2}]  }
   0x1   :  { %14 = vsyncpa [#allocation3 + $0x1], 0 }
   0x2   :  { %15 = vsyncpa [#allocation5], 0 }
   0x3   :  { %17 = vsyncpa [#allocation5 + $0x1], 0  ;;  %s2090_s21 = smov 0   ;;  %s2092_s22 = smov 0  }
   0x4   :  { %s2094_s23 = smov 0   ;;  %s2096_s24 = smov 0  }
   0x5 LB: > { %s2111_s25 = sadd.s32 4294967295, %s2039_s24   ;;  %s1686_s26 = sadd.s32 4294967294, %s2039_s24   ;;  %s2039_s24 = sphi %s2096_s24, %s2653_s24   ;;  %s2035_s23 = sphi %s2094_s23, %s2652_s23   ;;  %s2031_s22 = sphi %s2092_s22, %s2651_s22   ;;  %s2027_s21 = sphi %s2090_s21, %s2650_s21  }
   0x6   : > { %s2115_s27 = sadd.s32 1, %s2039_s24   ;;  %s129_s28 = sadd.s32 1, %s2035_s23 }
   0x7   : > { %s126_s29 = ssub.s32 %s2039_s24, %s2115_s27  ;;  %p139_p0 = scmp.ne.s32.totalorder %s2035_s23, %s2031_s22 }
   0x8   : > { %p127_p1 = scmp.eq.s32.totalorder %s126_s29, 0  ;;  %p140_p2 = scmp.eq.s32.totalorder %s2111_s25, 1 }
   0x9   : > { %p145_p3 = scmp.ne.s32.totalorder %s2031_s22, %s2027_s21  ;;  %p146_p4 = scmp.eq.s32.totalorder %s1686_s26, 1 }
   0xa   : > { %s2126_s30 = scalar_select %p127_p1, %s2035_s23, %s129_s28  }
   0xb   : > { %p2128_p5 = por %p140_p2, %p139_p0  ;;  %p2132_p6 = por %p146_p4, %p145_p3 }
   0xc   : > { %p1689_p7 = scmp.ge.s32.totalorder %s2039_s24, 1  ;;  %p242_p8 = scmp.lt.s32.totalorder %s2039_s24, 3 }
   0xe   : > { %p243_p9 = pnand %p1689_p7, %p242_p8 }
   0xf   : > { %p291_p10 = scmp.lt.s32.totalorder (!%p243_p9), %s2111_s25, 1  ;;  %v2041_v0 = vmov (!%p243_p9), 4   ;;  %vm437_vm0 = vcmask (!%p243_p9), 130048   ;;  %s2042_s18 = smov (!%p243_p9), 2   ;;  %v2043_v24 = vmov (!%p243_p9), 0   ;;  %v2044_v33 = vmov (!%p243_p9), 1  }
  0x10   : > { %246 = sbr.rel (%p243_p9) target bundleno = 6449 (0x1931), region = 36  ;;  %1922 = vset.pattern.permute.xlu0 (!%p243_p9), %v2041_v0  ;;  %vm2156_vm1 = vmpackc.low (!%p243_p9), %vm437_vm0, %vm437_vm0  ;;  %1923 = vset.pattern.permute.xlu1 (!%p243_p9), %v2043_v24  ;;  %v2045_v40 = vmov (!%p243_p9), 2   ;;  %v348_v56 = vlaneseq (!%p243_p9)  ;;  %v2046_v59 = vmov (!%p243_p9), 0.0   ;;  %s2047_s19 = smov (!%p243_p9), 127   ;;  %v2048_v0 = vmov (!%p243_p9), 3  }
  0x11   : > { %v2049_v1 = vmov (!%p243_p9), 5   ;;  %s2541_s16 = sand.u32 (!%p243_p9), 1, %s2031_s22  }
  0x12   : > { %v2229_v57 = vand.u32 (!%p243_p9), 127, %v348_v56  ;;  %s1503_s28 = scalar_lea.sflag (!%p243_p9), [#allocation3], %s2541_s16 }
  0x17   : > { %s2140_s9 = scalar_select %p291_p10, %s2111_s25, 1 }
  0x19   : > { %s1696_s10 = sshll.u32 %s2140_s9, 3  ;;  %s1773_s11 = sshll.u32 %s2140_s9, 8 }
  0x1a   : > { %s304_s14 = scalar_lea.vmem %s2642_s3, %s1696_s10  ;;  %s2152_s17 = scalar_lea.vmem %s2639_s0, %s1773_s11 }
  0x1b   : > { %v2160_v2 = vld [vmem:[%s304_s14] sm:$0xff]  ;;  %v327_v4 = vld [vmem:[%s2152_s17 + $0x88] sm:$0xff]  ;;  %v328_v9 = vld [vmem:[%s2152_s17 + $0x90] sm:$0xff]  ;;  %s1774_s20 = sshll.u32 %s2140_s9, 4  ;;  %s309_s15 = scalar_lea.vmem %s2645_s6, %s1696_s10 }
  0x1c   : > { %v326_v3 = vld [vmem:[%s2152_s17 + $0x80] sm:$0xff]  ;;  %v1860_v5 = vtrunc.f32 %v2160_v2  ;;  %v311_v8 = vld [vmem:[%s2152_s17 + $0x8] sm:$0xff]  ;;  %v329_v11 = vld [vmem:[%s2152_s17 + $0x98] sm:$0xff]  ;;  %s300_s29 = scalar_lea.vmem %s2640_s1, %s1774_s20  ;;  %s1690_s9 = sshll.u32 %s2541_s16, 3 }
  0x1d   : > { %v1812_v6 = vpack.c.bf16 %v327_v4, %v326_v3  ;;  %v310_v7 = vld [vmem:[%s2152_s17] sm:$0xff]  ;;  %v1818_v13 = vpack.c.bf16 %v329_v11, %v328_v9  ;;  %v312_v14 = vld [vmem:[%s2152_s17 + $0x10] sm:$0xff]  ;;  %v313_v15 = vld [vmem:[%s2152_s17 + $0x18] sm:$0xff]  ;;  %v2050_v3 = vmov 6   ;;  %s1776_s10 = sshll.u32 %s2111_s25, 7  ;;  %s2051_s11 = smov [#allocation2]  }
  0x1e   : > { %v1815_v10 = vpack.c.bf16 %v311_v8, %v310_v7  ;;  %v1861_v12 = vcvt.f32.s32 %v1860_v5  ;;  %v330_v16 = vld [vmem:[%s2152_s17 + $0xa0] sm:$0xff]  ;;  %v331_v17 = vld [vmem:[%s2152_s17 + $0xa8] sm:$0xff]  ;;  %v1821_v18 = vpack.c.bf16 %v313_v15, %v312_v14  ;;  %v332_v22 = vld [vmem:[%s2152_s17 + $0xb0] sm:$0xff]  ;;  %s2552_s26 = scalar_lea.hbm %s2643_s4, %s1776_s10  ;;  %s1949_s12 = sshll.u32 %s2051_s11, 4  ;;  %s1950_s12 = int_to_ptr.vmem [resolvable:$false] %s1949_s12 }
  0x1f   : > { %1814 = vmatprep.subr.msk.bf16.mxu0 %vm2156_vm1, %v1812_v6  ;;  %v1824_v19 = vpack.c.bf16 %v331_v17, %v330_v16  ;;  %v314_v20 = vld [vmem:[%s2152_s17 + $0x20] sm:$0xff]  ;;  %v315_v21 = vld [vmem:[%s2152_s17 + $0x28] sm:$0xff]  ;;  %v333_v23 = vld [vmem:[%s2152_s17 + $0xb8] sm:$0xff]  ;;  %s1951_s13 = scalar_lea.vmem %s1950_s12, 256 }
  0x20   : > { %1817 = vmatpush3.bf16.xpose.msk.msra.mxu0 %vm2156_vm1, %v1815_v10  ;;  %432 = vperm.xlu0 %1922, %v1861_v12   ;;  %v1827_v25 = vpack.c.bf16 %v315_v21, %v314_v20  ;;  %v1830_v26 = vpack.c.bf16 %v333_v23, %v332_v22  ;;  %v316_v27 = vld [vmem:[%s2152_s17 + $0x30] sm:$0xff]  ;;  %v317_v28 = vld [vmem:[%s2152_s17 + $0x38] sm:$0xff]  ;;  %v334_v29 = vld [vmem:[%s2152_s17 + $0xc0] sm:$0xff]  ;;  %v2260_v12 = vshrl.u32 %v348_v56, 7 }
  0x21   : > { %1820 = vmatprep.subr.msk.bf16.mxu0 %vm2156_vm1, %v1818_v13  ;;  %v335_v30 = vld [vmem:[%s2152_s17 + $0xc8] sm:$0xff]  ;;  %v1833_v31 = vpack.c.bf16 %v317_v28, %v316_v27  ;;  %v318_v34 = vld [vmem:[%s2152_s17 + $0x40] sm:$0xff]  ;;  %v336_v36 = vld [vmem:[%s2152_s17 + $0xd0] sm:$0xff] }
  0x22   : > { %v1836_v32 = vpack.c.bf16 %v335_v30, %v334_v29  ;;  %v319_v35 = vld [vmem:[%s2152_s17 + $0x48] sm:$0xff]  ;;  %v337_v37 = vld [vmem:[%s2152_s17 + $0xd8] sm:$0xff]  ;;  %v320_v41 = vld [vmem:[%s2152_s17 + $0x50] sm:$0xff]  ;;  %v2267_v16 = vsub.s32 1, %v2260_v12  ;;  %v2270_v17 = vsub.s32 0, %v2260_v12  ;;  %v2276_v21 = vsub.s32 3, %v2260_v12 }
  0x23   : > { %v1839_v38 = vpack.c.bf16 %v319_v35, %v318_v34  ;;  %v1842_v39 = vpack.c.bf16 %v337_v37, %v336_v36  ;;  %v321_v42 = vld [vmem:[%s2152_s17 + $0x58] sm:$0xff]  ;;  %v338_v43 = vld [vmem:[%s2152_s17 + $0xe0] sm:$0xff]  ;;  %v339_v44 = vld [vmem:[%s2152_s17 + $0xe8] sm:$0xff] }
  0x24   : > { %610 = vrot.lane.b32.xlu0 %v2160_v2, %s2042_s18  ;;  %v1845_v45 = vpack.c.bf16 %v321_v42, %v320_v41  ;;  %v1848_v46 = vpack.c.bf16 %v339_v44, %v338_v43  ;;  %v322_v47 = vld [vmem:[%s2152_s17 + $0x60] sm:$0xff]  ;;  %v323_v48 = vld [vmem:[%s2152_s17 + $0x68] sm:$0xff]  ;;  %v340_v49 = vld [vmem:[%s2152_s17 + $0xf0] sm:$0xff] }
  0x25   : > { %1924 = vset.pattern.permute.xlu0 %v2044_v33  ;;  %v341_v50 = vld [vmem:[%s2152_s17 + $0xf8] sm:$0xff]  ;;  %v1851_v51 = vpack.c.bf16 %v323_v48, %v322_v47  ;;  %v324_v53 = vld [vmem:[%s2152_s17 + $0x70] sm:$0xff]  ;;  %v2252_v8 = vld [vmem:[%s300_s29] sm:$0x1f] }
  0x26   : > { %v1854_v52 = vpack.c.bf16 %v341_v50, %v340_v49  ;;  %v325_v54 = vld [vmem:[%s2152_s17 + $0x78] sm:$0xff]  ;;  %v2254_v9 = vld [vmem:[%s300_s29 + $0x8] sm:$0x1f]  ;;  %v662_v22 = vrot.slane %v2252_v8, %v2267_v16  ;;  %v638_v27 = vrot.slane %v2252_v8, %v2270_v17  ;;  %v652_v29 = vrot.slane %v2252_v8, %v2276_v21  ;;  %s276_s17 = scalar_lea.vmem [#allocation2], %s1690_s9 }
  0x27   : > { %v1857_v55 = vpack.c.bf16 %v325_v54, %v324_v53  ;;  %v618_v11 = vrot.slane %v2254_v9, 6  ;;  %v666_v23 = vrot.slane %v2254_v9, %v2267_v16  ;;  %v642_v28 = vrot.slane %v2254_v9, %v2270_v17  ;;  %s1527_s18 = sshll.u32 %s276_s17, 4  ;;  %s2554_s18 = int_to_ptr.vmem [resolvable:$true] %s1527_s18 }
  0x28   : > { %1823 = vmatpush3.bf16.xpose.msk.msra.mxu0 %vm2156_vm1, %v1821_v18  ;;  %392 = vperm.xlu0 %1924, %v2160_v2   ;;  %v2273_v18 = vsub.s32 2, %v2260_v12  ;;  %v656_v30 = vrot.slane %v2254_v9, %v2276_v21  ;;  %v771_v54 = vsub.s32 4, %v2260_v12  ;;  %s1945_s29 = scalar_lea.vmem %s2554_s18, 128  ;;  %p1952_p0 = scmp.lt.s32.totalorder %s2554_s18, %s1950_s12 }
  0x29   : > { %1826 = vmatprep.subr.msk.bf16.mxu0 %vm2156_vm1, %v1824_v19  ;;  %v622_v14 = vsub.f32 %v2254_v9, %v618_v11  ;;  %p1946_p11 = scmp.ne.s32.totalorder %s2554_s18, %s1945_s29  ;;  %p1953_p1 = scmp.lt.s32.totalorder %s1951_s13, %s1945_s29 }
  0x2b   : > { %v624_v20 = vadd.f32 1e-07, %v622_v14  ;;  %p1947_p12 = pnand %p1946_p11, %p2128_p5  ;;  %p1954_p2 = por %p1953_p1, %p1952_p0 }
  0x2c   : > { %1927 = vset.pattern.permute.xlu0 %v2045_v40 }
  0x2d   : > { %v683_v37 = vrot.slane %v624_v20, 1  ;;  %v776_v20 = vrot.slane %v2254_v9, %v771_v54  ;;  %p1948_p13 = pneg %p1947_p12 }
  0x2f   : > { %v687_v43 = vmul.f32 %v683_v37, %v622_v14  ;;  %p1955_p3 = pnand %p1954_p2, %p1948_p13 }
  0x30   : > { %1829 = vmatpush3.bf16.xpose.msk.msra.mxu0 %vm2156_vm1, %v1827_v25  ;;  %v628_v25 = vrot.slane %v2252_v8, %v2273_v18 }
  0x31   : > { %1832 = vmatprep.subr.msk.bf16.mxu0 %vm2156_vm1, %v1830_v26  ;;  %v632_v26 = vrot.slane %v2254_v9, %v2273_v18  ;;  %v700_v49 = vrot.slane %v687_v43, %v2273_v18 }
  0x38   : > { %1835 = vmatpush3.bf16.xpose.msk.msra.mxu0 %vm2156_vm1, %v1833_v31 }
  0x39   : > { %1838 = vmatprep.subr.msk.bf16.mxu0 %vm2156_vm1, %v1836_v32 }
  0x40   : > { %1841 = vmatpush3.bf16.xpose.msk.msra.mxu0 %vm2156_vm1, %v1839_v38 }
  0x41   : > { %1844 = vmatprep.subr.msk.bf16.mxu0 %vm2156_vm1, %v1842_v39 }
  0x48   : > { %1847 = vmatpush3.bf16.xpose.msk.msra.mxu0 %vm2156_vm1, %v1845_v45 }
  0x49   : > { %1850 = vmatprep.subr.msk.bf16.mxu0 %vm2156_vm1, %v1848_v46 }
  0x50   : > { %1853 = vmatpush3.bf16.xpose.msk.msra.mxu0 %vm2156_vm1, %v1851_v51 }
  0x51   : > { %1856 = vmatprep.subr.msk.bf16.mxu0 %vm2156_vm1, %v1854_v52 }
  0x58   : > { %1859 = vmatpush3.bf16.xpose.msk.msra.mxu0 %vm2156_vm1, %v1857_v55 }
  0x9f   : > { %v2231_v58 = vpop.permute.xlu0 %432 }
  0xa0   : > { %vm434_vm2 = vcmp.eq.s32.totalorder %v2229_v57, %v2231_v58 }
  0xa1   : > { %v1701_v60 = vsel %vm434_vm2, 1.0, %v2046_v59 }
  0xa2   : > { %1810 = vmatprep.mubr.msk.f32.mxu0 %vm437_vm0, %v1701_v60 }
  0xa3   : > { %v611_v61 = vpop.permute.xlu0 %610  ;;  %1811 = vmatmul.mubr.msk.f32.vlgmr.msra.gmra.mrb[0].mxu0 %vm437_vm0, %v1701_v60 }
  0xa4   : > { %v613_v62 = vsub.f32 %v2160_v2, %v611_v61 }
  0xa6   : > { %v614_v63 = vadd.f32 1e-07, %v613_v62 }
  0xa7   : > { %v2282_v24 = vpop.permute.xlu0 %392 }
  0xa8   : > { %676 = vrot.lane.b32.xlu1 %v614_v63, %s2047_s19  ;;  %v667_v31 = vmax.f32 %v2282_v24, %v662_v22  ;;  %v668_v32 = vmax.f32 %v2282_v24, %v666_v23  ;;  %v719_v56 = vmin.f32 %v2282_v24, %v662_v22  ;;  %v720_v60 = vmin.f32 %v2282_v24, %v666_v23 }
  0xac   : > { %368 = vperm.xlu1 %1923, %v2160_v2  }
  0xb0   : > { %1925 = vset.pattern.permute.xlu1 %v2045_v40 }
  0xb1   : > { %398 = vperm.xlu1 %1925, %v2160_v2  }
  0xb5   : > { %1926 = vset.pattern.permute.xlu1 %v2048_v0 }
  0xb6   : > { %404 = vperm.xlu1 %1926, %v2160_v2  }
  0xba   : > { %1928 = vset.pattern.permute.xlu1 %v2049_v1 }
  0xbb   : > { %778 = vperm.xlu1 %1928, %v2160_v2  }
  0xbf   : > { %1929 = vset.pattern.permute.xlu1 %v2050_v3 }
  0xc0   : > { %422 = vperm.xlu1 %1929, %v2160_v2   ;;  %v617_v2 = vrot.slane %v2252_v8, 6 }
  0xc2   : > { %v621_v13 = vsub.f32 %v2252_v8, %v617_v2 }
  0xc4   : > { %v623_v19 = vadd.f32 1e-07, %v621_v13 }
  0xc6   : > { %v682_v36 = vrot.slane %v623_v19, 1  ;;  %v772_v19 = vrot.slane %v2252_v8, %v771_v54 }
  0xc8   : > { %v686_v42 = vmul.f32 %v682_v36, %v621_v13 }
  0xca   : > { %v696_v48 = vrot.slane %v686_v42, %v2273_v18 }
 0x11a   : > { %v677_v4 = vpop.permute.xlu1 %676 }
 0x11b   : > { %v679_v5 = vmul.f32 %v677_v4, %v613_v62 }
 0x11d   : > { %690 = vperm.xlu0 %1927, %v679_v5  }
 0x121   : > { %1930 = vset.pattern.permute.xlu0 %v2049_v1 }
 0x12b   : > { %v2256_v10 = vpop.permute.xlu1 %368 }
 0x12c   : > { %v643_v34 = vmax.f32 %v2256_v10, %v638_v27  ;;  %v644_v35 = vmax.f32 %v2256_v10, %v642_v28  ;;  %v713_v3 = vmin.f32 %v2256_v10, %v638_v27  ;;  %v714_v4 = vmin.f32 %v2256_v10, %v642_v28 }
 0x12d   : > { %v732_v27 = vrot.slane %v2254_v9, 2 }
 0x12f   : > { %v736_v37 = vadd.f32 %v732_v27, %v2254_v9 }
 0x130   : > { %v2264_v15 = vpop.permute.xlu1 %398 }
 0x131   : > { %v633_v38 = vmin.f32 %v2264_v15, %v628_v25  ;;  %v634_v39 = vmin.f32 %v2264_v15, %v632_v26  ;;  %v711_v1 = vmax.f32 %v2264_v15, %v628_v25  ;;  %v712_v13 = vmax.f32 %v2264_v15, %v632_v26  ;;  %v344_v26 = vld [vmem:[%s2641_s2] sm:$0xf] }
 0x132   : > { %v731_v25 = vrot.slane %v2252_v8, 2 }
 0x133   : > { %v645_v44 = vsub.f32 %v633_v38, %v643_v34  ;;  %v646_v45 = vsub.f32 %v634_v39, %v644_v35 }
 0x134   : > { %v735_v36 = vadd.f32 %v731_v25, %v2252_v8  ;;  %v744_v8 = vrot.slane %v736_v37, %v2270_v17 }
 0x135   : > { %v2298_v33 = vpop.permute.xlu1 %404  ;;  %v647_v50 = vmax.f32 %v645_v44, 0.0  ;;  %v648_v51 = vmax.f32 %v646_v45, 0.0  ;;  %v351_v45 = vrot.slane %v344_v26, %v2270_v17 }
 0x136   : > { %v657_v40 = vmin.f32 %v2298_v33, %v652_v29  ;;  %v658_v41 = vmin.f32 %v2298_v33, %v656_v30  ;;  %v717_v5 = vmax.f32 %v2298_v33, %v652_v29  ;;  %v718_v14 = vmax.f32 %v2298_v33, %v656_v30 }
 0x137   : > { %v716_v29 = vsub.f32 %v712_v13, %v714_v4  ;;  %v752_v9 = vrot.slane %v735_v36, %v2267_v16  ;;  %v361_v54 = vrot.slane %v351_v45, %v2270_v17 }
 0x138   : > { %v669_v46 = vsub.f32 %v657_v40, %v667_v31  ;;  %v670_v47 = vsub.f32 %v658_v41, %v668_v32  ;;  %v715_v31 = vsub.f32 %v711_v1, %v713_v3  ;;  %v721_v28 = vsub.f32 %v717_v5, %v719_v56 }
 0x139   : > { %v722_v34 = vsub.f32 %v718_v14, %v720_v60  ;;  %v376_v40 = vrot.slane %v344_v26, %v2267_v16  ;;  %v380_v41 = vrot.slane %v344_v26, %v2276_v21  ;;  %v724_v42 = vmul.f32 %v716_v29, %v716_v29 }
 0x13a   : > { %v671_v52 = vmax.f32 %v669_v46, 0.0  ;;  %v672_v53 = vmax.f32 %v670_v47, 0.0  ;;  %v779_v32 = vpop.permute.xlu1 %778  ;;  %v723_v38 = vmul.f32 %v715_v31, %v715_v31  ;;  %v725_v39 = vmul.f32 %v721_v28, %v721_v28 }
 0x13b   : > { %v781_v35 = vsub.f32 %v772_v19, %v779_v32  ;;  %v782_v30 = vsub.f32 %v776_v20, %v779_v32  ;;  %v726_v43 = vmul.f32 %v722_v34, %v722_v34  ;;  %v355_v46 = vrot.slane %v344_v26, %v2273_v18 }
 0x13c   : > { %v673_v61 = vmul.f32 %v671_v52, %v647_v50  ;;  %v674_v62 = vmul.f32 %v672_v53, %v648_v51  ;;  %v756_v50 = vrot.slane %v736_v37, %v2267_v16  ;;  %v386_v51 = vrot.slane %v376_v40, %v2267_v16 }
 0x13d   : > { %v783_v44 = vmul.f32 %v781_v35, %v781_v35  ;;  %v784_v47 = vmul.f32 %v782_v30, %v782_v30  ;;  %v390_v21 = vrot.slane %v380_v41, %v2267_v16  ;;  %v728_v52 = vadd.f32 %v726_v43, %v724_v42 }
 0x13e   : > { %v365_v18 = vrot.slane %v355_v46, %v2270_v17  ;;  %v758_v5 = vsub.f32 %v756_v50, %v2282_v24  ;;  %v395_v16 = vsub.f32 %v386_v51, %v2282_v24  ;;  %v401_v19 = vsub.f32 %v2264_v15, %v361_v54 }
 0x13f   : > { %v785_v53 = vmul.f32 0.40528473, %v783_v44  ;;  %v786_v56 = vmul.f32 0.40528473, %v784_v47  ;;  %v730_v13 = vadd.f32 1e-07, %v728_v52  ;;  %v407_v27 = vsub.f32 %v2298_v33, %v386_v51  ;;  %v423_v50 = vpop.permute.xlu1 %422 }
 0x140   : > { %v372_v14 = vsub.f32 %v365_v18, %v2256_v10  ;;  %v760_v31 = vsub.f32 %v758_v5, %v2298_v33  ;;  %v402_v28 = vsub.f32 %v2264_v15, %v365_v18  ;;  %v408_v32 = vsub.f32 %v2298_v33, %v390_v21 }
 0x141   : > { %v411_v26 = vmin.f32 %v401_v19, %v407_v27  ;;  %v2379_v27 = vadd.s32 128, %v2229_v57 }
 0x142   : > { %v764_v37 = vmul.f32 %v760_v31, %v760_v31 }
 0x176   : > { %v2244_v6 = vpop.f32.mrb[0].mxu0 }
 0x177   : > { %v2246_v7 = vpop.f32.mrb[1].mxu0 }
 0x19c   : > { %v691_v55 = vpop.permute.xlu0 %690 }
 0x19d   : > { %v701_v63 = vadd.f32 %v696_v48, %v691_v55  ;;  %v702_v0 = vadd.f32 %v700_v49, %v691_v55  ;;  %v740_v48 = vrot.slane %v735_v36, %v2270_v17  ;;  %v727_v49 = vadd.f32 %v725_v39, %v723_v38 }
 0x19e   : > { %v371_v17 = vsub.f32 %v361_v54, %v2256_v10  ;;  %v412_v38 = vmin.f32 %v402_v28, %v408_v32 }
 0x19f   : > { %v703_v2 = vsub.f32 %v701_v63, %v673_v61  ;;  %v704_v11 = vsub.f32 %v702_v0, %v674_v62  ;;  %v745_v60 = vsub.f32 %v740_v48, %v2256_v10  ;;  %v746_v63 = vsub.f32 %v744_v8, %v2256_v10 }
 0x1a0   : > { %v757_v0 = vsub.f32 %v752_v9, %v2282_v24  ;;  %v729_v4 = vadd.f32 1e-07, %v727_v49  ;;  %v409_v30 = vmin.f32 %v371_v17, %v395_v16 }
 0x1a1   : > { %v705_v22 = vadd.f32 1e-07, %v703_v2  ;;  %v706_v23 = vadd.f32 1e-07, %v704_v11  ;;  %v396_v2 = vsub.f32 %v390_v21, %v2282_v24 }
 0x1a2   : > { %v413_v41 = vmin.f32 %v409_v30, %v411_v26 }
 0x1a3   : > { %1931 = vrcp.f32 %v705_v22  ;;  %v747_v22 = vsub.f32 %v745_v60, %v2264_v15  ;;  %v410_v39 = vmin.f32 %v372_v14, %v396_v2 }
 0x1a4   : > { %1933 = vrcp.f32 %v706_v23  ;;  %v759_v23 = vsub.f32 %v757_v0, %v2298_v33  ;;  %vm415_vm3 = vcmp.gt.f32.partialorder %v413_v41, 1e-09 }
 0x1a5   : > { %1935 = vrcp.f32 %v729_v4  ;;  %v761_v34 = vmul.f32 %v747_v22, %v747_v22  ;;  %v414_v43 = vmin.f32 %v410_v39, %v412_v38  ;;  %v1699_v51 = vsel %vm415_vm3, 1.0, %v2046_v59 }
 0x1a6   : > { %1937 = vrcp.f32 %v730_v13  ;;  %v763_v35 = vmul.f32 %v759_v23, %v759_v23 }
 0x1a7   : > { %vm416_vm4 = vcmp.gt.f32.partialorder %v414_v43, 1e-09 }
 0x1a8   : > { %v765_v40 = vadd.f32 %v763_v35, %v761_v34  ;;  %v1700_v54 = vsel %vm416_vm4, 1.0, %v2046_v59 }
 0x1aa   : > { %v767_v46 = vmul.f32 0.25, %v765_v40 }
 0x1ad   : > { %v1932_v55 = vpop.eup %1931 }
 0x1ae   : > { %v1934_v1 = vpop.eup %1933  ;;  %v708_v3 = vmul.f32 %v1932_v55, %v673_v61  ;;  %v748_v61 = vsub.f32 %v746_v63, %v2264_v15  ;;  %v2356_v63 = vmul.f32 %v1699_v51, %v423_v50 }
 0x1af   : > { %v710_v11 = vmul.f32 %v1934_v1, %v674_v62  ;;  %v1936_v44 = vpop.eup %1935  ;;  %v2358_v1 = vmul.f32 %v1700_v54, %v423_v50 }
 0x1b0   : > { %v787_v20 = vsub.f32 %v785_v53, %v708_v3  ;;  %v762_v36 = vmul.f32 %v748_v61, %v748_v61  ;;  %v1938_v45 = vpop.eup %1937  ;;  %v796_v21 = vmul.f32 %v1936_v44, %v767_v46  ;;  %vm427_vm5 = vcmp.gt.f32.partialorder %v2356_v63, 0.0 }
 0x1b1   : > { %v788_v25 = vsub.f32 %v786_v56, %v710_v11  ;;  %vm428_vm6 = vcmp.gt.f32.partialorder %v2358_v1, 0.0 }
 0x1b2   : > { %v789_v62 = vadd.f32 1.0000001, %v787_v20  ;;  %v766_v42 = vadd.f32 %v764_v37, %v762_v36  ;;  %v609_v22 = vsel %vm428_vm6, %v2246_v7, 0.0 }
 0x1b3   : > { %v790_v29 = vadd.f32 1.0000001, %v788_v25 }
 0x1b4   : > { %1939 = vrcp.f32 %v789_v62  ;;  %v768_v48 = vmul.f32 0.25, %v766_v42 }
 0x1b5   : > { %1941 = vrcp.f32 %v790_v29 }
 0x1b6   : > { %v798_v18 = vmul.f32 %v1938_v45, %v768_v48 }
 0x1be   : > { %v1940_v47 = vpop.eup %1939 }
 0x1bf   : > { %v1942_v8 = vpop.eup %1941  ;;  %v792_v9 = vmul.f32 %v1940_v47, %v785_v53 }
 0x1c0   : > { %v794_v49 = vmul.f32 %v1942_v8, %v786_v56 }
 0x1c1   : > { %v799_v52 = vmul.f32 %v792_v9, %v785_v53 }
 0x1c2   : > { %v800_v55 = vmul.f32 %v794_v49, %v786_v56 }
 0x1c3   : > { %v801_v60 = vadd.f32 %v799_v52, %v796_v21 }
 0x1c4   : > { %v802_v0 = vadd.f32 %v800_v55, %v798_v18 }
 0x1c5   : > { %v803_v4 = vsub.f32 %v708_v3, %v801_v60 }
 0x1c6   : > { %v804_v5 = vsub.f32 %v710_v11, %v802_v0  ;;  %v608_v11 = vsel %vm427_vm5, %v2244_v6, 0.0 }
 0x1c7   : > { %v805_v16 = vmax.f32 %v803_v4, 0.0 }
 0x1c8   : > { %v806_v2 = vmax.f32 %v804_v5, 0.0 }
 0x1c9   : > { %v2362_v13 = vsel %vm427_vm5, %v805_v16, 0.0 }
 0x1ca   : > { %v2364_v53 = vsel %vm428_vm6, %v806_v2, 0.0  ;;  %v809_v56 = vmul.f32 %v2362_v13, %v2362_v13 }
 0x1cb   : > { %v810_v17 = vmul.f32 %v2364_v53, %v2364_v53 }
 0x1cc   : > { %v811_v14 = vmul.f32 %v809_v56, %v809_v56 }
 0x1cd   : > { %v812_v19 = vmul.f32 %v810_v17, %v810_v17 }
 0x1ce   : > { %v813_v3 = vmul.f32 %v811_v14, %v809_v56 }
 0x1cf   : > { %v814_v20 = vmul.f32 %v812_v19, %v810_v17 }
 0x1d0   : > { %v2372_v61 = vmul.f32 %v813_v3, %v608_v11 }
 0x1d1   : > { %v2374_v23 = vmul.f32 %v814_v20, %v609_v22 }
 0x1d3   : > { %v818_v25 = vmax.f32 %v2372_v61, %v2374_v23 }
 0x1d5   : > { %819 = vmax.xlane.f32.xlu0 %v818_v25 }
 0x262   : > { %v820_v31 = vpop.xlane.xlu0 %819 }
 0x263   : > { %vm821_vm7 = vcmp.eq.f32.partialorder %v2372_v61, %v820_v31  ;;  %vm822_vm8 = vcmp.eq.f32.partialorder %v2374_v23, %v820_v31 }
 0x264   : > { %v823_v6 = vsel %vm821_vm7, %v2229_v57, 256  ;;  %v824_v7 = vsel %vm822_vm8, %v2379_v27, 256 }
 0x265   : > { %vm825_vm9 = vcmp.lt.s32.totalorder %v823_v6, %v824_v7 }
 0x266   : > { %v826_v62 = vsel %vm825_vm9, %v823_v6, %v824_v7 }
 0x267   : > { %v828_v28 = vshra.s32 %v826_v62, 16  ;;  %v827_v29 = vand.u32 65535, %v826_v62 }
 0x269   : > { %v830_v32 = vcvt.s32.f32 %v828_v28  ;;  %v829_v35 = vcvt.s32.f32 %v827_v29 }
 0x26b   : > { %831 = vmin.xlane.f32.xlu1 %v830_v32 }
 0x2f8   : > { %v832_v34 = vpop.xlane.xlu1 %831 }
 0x2f9   : > { %vm833_vm10 = vcmp.eq.f32.partialorder %v830_v32, %v832_v34  ;;  %v838_v30 = vcvt.f32.s32 %v832_v34 }
 0x2fa   : > { %v834_v26 = vsel %vm833_vm10, %v829_v35, inf }
 0x2fb   : > { %835 = vmin.xlane.f32.xlu0 %v834_v26  ;;  %v839_v37 = vshll.u32 %v838_v30, 16 }
 0x388   : > { %v836_v36 = vpop.xlane.xlu0 %835 }
 0x389   : > { %v837_v38 = vcvt.f32.s32 %v836_v36 }
 0x38b   : > { %v840_v39 = vadd.s32 %v839_v37, %v837_v38 }
 0x38d   : > { %vm841_vm11 = vcmp.eq.s32.totalorder %v2229_v57, %v840_v39  ;;  %vm842_vm12 = vcmp.eq.s32.totalorder %v2379_v27, %v840_v39 }
 0x38e   : > { %v849_v40 = vsel %vm841_vm11, -inf, %v2372_v61  ;;  %v850_v41 = vsel %vm842_vm12, -inf, %v2374_v23  ;;  %v1735_v55 = vsel %vm841_vm11, 1.0, %v2046_v59  ;;  %v1736_v60 = vsel %vm842_vm12, 1.0, %v2046_v59 }
 0x38f   : > { %v851_v42 = vmax.f32 %v849_v40, %v850_v41 }
 0x391   : > { %852 = vmax.xlane.f32.xlu0 %v851_v42 }
 0x41e   : > { %v853_v43 = vpop.xlane.xlu0 %852 }
 0x41f   : > { %vm854_vm13 = vcmp.eq.f32.partialorder %v849_v40, %v853_v43  ;;  %vm855_vm14 = vcmp.eq.f32.partialorder %v850_v41, %v853_v43 }
 0x420   : > { %v856_v44 = vsel %vm854_vm13, %v2229_v57, 256  ;;  %v857_v45 = vsel %vm855_vm14, %v2379_v27, 256 }
 0x421   : > { %vm858_vm15 = vcmp.lt.s32.totalorder %v856_v44, %v857_v45 }
 0x422   : > { %v859_v46 = vsel %vm858_vm15, %v856_v44, %v857_v45 }
 0x423   : > { %v861_v47 = vshra.s32 %v859_v46, 16  ;;  %v860_v8 = vand.u32 65535, %v859_v46 }
 0x425   : > { %v863_v48 = vcvt.s32.f32 %v861_v47  ;;  %v862_v49 = vcvt.s32.f32 %v860_v8 }
 0x427   : > { %864 = vmin.xlane.f32.xlu1 %v863_v48 }
 0x4b4   : > { %v865_v9 = vpop.xlane.xlu1 %864 }
 0x4b5   : > { %vm866_vm0 = vcmp.eq.f32.partialorder %v863_v48, %v865_v9  ;;  %v871_v51 = vcvt.f32.s32 %v865_v9 }
 0x4b6   : > { %v867_v50 = vsel %vm866_vm0, %v862_v49, inf }
 0x4b7   : > { %868 = vmin.xlane.f32.xlu0 %v867_v50  ;;  %v872_v52 = vshll.u32 %v871_v51, 16 }
 0x544   : > { %v869_v21 = vpop.xlane.xlu0 %868 }
 0x545   : > { %v870_v54 = vcvt.f32.s32 %v869_v21 }
 0x547   : > { %v873_v18 = vadd.s32 %v872_v52, %v870_v54 }
 0x549   : > { %vm874_vm1 = vcmp.eq.s32.totalorder %v2229_v57, %v873_v18  ;;  %vm875_vm2 = vcmp.eq.s32.totalorder %v2379_v27, %v873_v18 }
 0x54a   : > { %v1737_v0 = vsel %vm874_vm1, 1.0, %v2046_v59  ;;  %v1738_v4 = vsel %vm875_vm2, 1.0, %v2046_v59  ;;  %v882_v5 = vsel %vm874_vm1, -inf, %v849_v40  ;;  %v883_v16 = vsel %vm875_vm2, -inf, %v850_v41 }
 0x54b   : > { %v880_v2 = vadd.f32 %v1737_v0, %v1735_v55  ;;  %v881_v56 = vadd.f32 %v1738_v4, %v1736_v60  ;;  %v884_v17 = vmax.f32 %v882_v5, %v883_v16 }
 0x54d   : > { %885 = vmax.xlane.f32.xlu1 %v884_v17 }
 0x5da   : > { %v886_v14 = vpop.xlane.xlu1 %885 }
 0x5db   : > { %vm887_vm3 = vcmp.eq.f32.partialorder %v882_v5, %v886_v14  ;;  %vm888_vm4 = vcmp.eq.f32.partialorder %v883_v16, %v886_v14 }
 0x5dc   : > { %v889_v19 = vsel %vm887_vm3, %v2229_v57, 256  ;;  %v890_v3 = vsel %vm888_vm4, %v2379_v27, 256 }
 0x5dd   : > { %vm891_vm5 = vcmp.lt.s32.totalorder %v889_v19, %v890_v3 }
 0x5de   : > { %v892_v11 = vsel %vm891_vm5, %v889_v19, %v890_v3 }
 0x5df   : > { %v894_v20 = vshra.s32 %v892_v11, 16  ;;  %v893_v25 = vand.u32 65535, %v892_v11 }
 0x5e1   : > { %v896_v22 = vcvt.s32.f32 %v894_v20  ;;  %v895_v6 = vcvt.s32.f32 %v893_v25 }
 0x5e3   : > { %897 = vmin.xlane.f32.xlu0 %v896_v22 }
 0x670   : > { %v898_v31 = vpop.xlane.xlu0 %897 }
 0x671   : > { %vm899_vm6 = vcmp.eq.f32.partialorder %v896_v22, %v898_v31  ;;  %v904_v62 = vcvt.f32.s32 %v898_v31 }
 0x672   : > { %v900_v7 = vsel %vm899_vm6, %v895_v6, inf }
 0x673   : > { %901 = vmin.xlane.f32.xlu1 %v900_v7  ;;  %v905_v32 = vshll.u32 %v904_v62, 16 }
 0x700   : > { %v902_v28 = vpop.xlane.xlu1 %901 }
 0x701   : > { %v903_v29 = vcvt.f32.s32 %v902_v28 }
 0x703   : > { %v906_v34 = vadd.s32 %v905_v32, %v903_v29 }
 0x705   : > { %vm907_vm7 = vcmp.eq.s32.totalorder %v2229_v57, %v906_v34  ;;  %vm908_vm8 = vcmp.eq.s32.totalorder %v2379_v27, %v906_v34 }
 0x706   : > { %v1739_v35 = vsel %vm907_vm7, 1.0, %v2046_v59  ;;  %v1740_v26 = vsel %vm908_vm8, 1.0, %v2046_v59  ;;  %v915_v30 = vsel %vm907_vm7, -inf, %v882_v5  ;;  %v916_v36 = vsel %vm908_vm8, -inf, %v883_v16 }
 0x707   : > { %v913_v37 = vadd.f32 %v1739_v35, %v880_v2  ;;  %v914_v38 = vadd.f32 %v1740_v26, %v881_v56  ;;  %v917_v39 = vmax.f32 %v915_v30, %v916_v36 }
 0x709   : > { %918 = vmax.xlane.f32.xlu0 %v917_v39 }
 0x796   : > { %v919_v40 = vpop.xlane.xlu0 %918 }
 0x797   : > { %vm920_vm9 = vcmp.eq.f32.partialorder %v915_v30, %v919_v40  ;;  %vm921_vm10 = vcmp.eq.f32.partialorder %v916_v36, %v919_v40 }
 0x798   : > { %v922_v41 = vsel %vm920_vm9, %v2229_v57, 256  ;;  %v923_v42 = vsel %vm921_vm10, %v2379_v27, 256 }
 0x799   : > { %vm924_vm11 = vcmp.lt.s32.totalorder %v922_v41, %v923_v42 }
 0x79a   : > { %v925_v43 = vsel %vm924_vm11, %v922_v41, %v923_v42 }
 0x79b   : > { %v927_v44 = vshra.s32 %v925_v43, 16  ;;  %v926_v46 = vand.u32 65535, %v925_v43 }
 0x79d   : > { %v929_v45 = vcvt.s32.f32 %v927_v44  ;;  %v928_v48 = vcvt.s32.f32 %v926_v46 }
 0x79f   : > { %930 = vmin.xlane.f32.xlu1 %v929_v45 }
 0x82c   : > { %v931_v47 = vpop.xlane.xlu1 %930 }
 0x82d   : > { %vm932_vm12 = vcmp.eq.f32.partialorder %v929_v45, %v931_v47  ;;  %v937_v9 = vcvt.f32.s32 %v931_v47 }
 0x82e   : > { %v933_v8 = vsel %vm932_vm12, %v928_v48, inf }
 0x82f   : > { %934 = vmin.xlane.f32.xlu0 %v933_v8  ;;  %v938_v50 = vshll.u32 %v937_v9, 16 }
 0x8bc   : > { %v935_v49 = vpop.xlane.xlu0 %934 }
 0x8bd   : > { %v936_v51 = vcvt.f32.s32 %v935_v49 }
 0x8bf   : > { %v939_v21 = vadd.s32 %v938_v50, %v936_v51 }
 0x8c1   : > { %vm940_vm13 = vcmp.eq.s32.totalorder %v2229_v57, %v939_v21  ;;  %vm941_vm14 = vcmp.eq.s32.totalorder %v2379_v27, %v939_v21 }
 0x8c2   : > { %v1741_v52 = vsel %vm940_vm13, 1.0, %v2046_v59  ;;  %v1742_v54 = vsel %vm941_vm14, 1.0, %v2046_v59  ;;  %v948_v18 = vsel %vm940_vm13, -inf, %v915_v30  ;;  %v949_v55 = vsel %vm941_vm14, -inf, %v916_v36 }
 0x8c3   : > { %v946_v60 = vadd.f32 %v1741_v52, %v913_v37  ;;  %v947_v0 = vadd.f32 %v1742_v54, %v914_v38  ;;  %v950_v4 = vmax.f32 %v948_v18, %v949_v55 }
 0x8c5   : > { %951 = vmax.xlane.f32.xlu1 %v950_v4 }
 0x952   : > { %v952_v5 = vpop.xlane.xlu1 %951 }
 0x953   : > { %vm953_vm15 = vcmp.eq.f32.partialorder %v948_v18, %v952_v5  ;;  %vm954_vm0 = vcmp.eq.f32.partialorder %v949_v55, %v952_v5 }
 0x954   : > { %v955_v16 = vsel %vm953_vm15, %v2229_v57, 256  ;;  %v956_v2 = vsel %vm954_vm0, %v2379_v27, 256 }
 0x955   : > { %vm957_vm1 = vcmp.lt.s32.totalorder %v955_v16, %v956_v2 }
 0x956   : > { %v958_v56 = vsel %vm957_vm1, %v955_v16, %v956_v2 }
 0x957   : > { %v960_v17 = vshra.s32 %v958_v56, 16  ;;  %v959_v19 = vand.u32 65535, %v958_v56 }
 0x959   : > { %v962_v14 = vcvt.s32.f32 %v960_v17  ;;  %v961_v11 = vcvt.s32.f32 %v959_v19 }
 0x95b   : > { %963 = vmin.xlane.f32.xlu0 %v962_v14 }
 0x9e8   : > { %v964_v3 = vpop.xlane.xlu0 %963 }
 0x9e9   : > { %vm965_vm2 = vcmp.eq.f32.partialorder %v962_v14, %v964_v3  ;;  %v970_v22 = vcvt.f32.s32 %v964_v3 }
 0x9ea   : > { %v966_v20 = vsel %vm965_vm2, %v961_v11, inf }
 0x9eb   : > { %967 = vmin.xlane.f32.xlu1 %v966_v20  ;;  %v971_v31 = vshll.u32 %v970_v22, 16 }
 0xa78   : > { %v968_v25 = vpop.xlane.xlu1 %967 }
 0xa79   : > { %v969_v6 = vcvt.f32.s32 %v968_v25 }
 0xa7b   : > { %v972_v7 = vadd.s32 %v971_v31, %v969_v6 }
 0xa7d   : > { %vm973_vm3 = vcmp.eq.s32.totalorder %v2229_v57, %v972_v7  ;;  %vm974_vm4 = vcmp.eq.s32.totalorder %v2379_v27, %v972_v7 }
 0xa7e   : > { %v1743_v62 = vsel %vm973_vm3, 1.0, %v2046_v59  ;;  %v1744_v28 = vsel %vm974_vm4, 1.0, %v2046_v59  ;;  %v981_v32 = vsel %vm973_vm3, -inf, %v948_v18  ;;  %v982_v29 = vsel %vm974_vm4, -inf, %v949_v55 }
 0xa7f   : > { %v979_v34 = vadd.f32 %v1743_v62, %v946_v60  ;;  %v980_v35 = vadd.f32 %v1744_v28, %v947_v0  ;;  %v983_v26 = vmax.f32 %v981_v32, %v982_v29 }
 0xa81   : > { %984 = vmax.xlane.f32.xlu0 %v983_v26 }
 0xb0e   : > { %v985_v30 = vpop.xlane.xlu0 %984 }
 0xb0f   : > { %vm986_vm5 = vcmp.eq.f32.partialorder %v981_v32, %v985_v30  ;;  %vm987_vm6 = vcmp.eq.f32.partialorder %v982_v29, %v985_v30 }
 0xb10   : > { %v988_v36 = vsel %vm986_vm5, %v2229_v57, 256  ;;  %v989_v37 = vsel %vm987_vm6, %v2379_v27, 256 }
 0xb11   : > { %vm990_vm7 = vcmp.lt.s32.totalorder %v988_v36, %v989_v37 }
 0xb12   : > { %v991_v38 = vsel %vm990_vm7, %v988_v36, %v989_v37 }
 0xb13   : > { %v993_v39 = vshra.s32 %v991_v38, 16  ;;  %v992_v41 = vand.u32 65535, %v991_v38 }
 0xb15   : > { %v995_v40 = vcvt.s32.f32 %v993_v39  ;;  %v994_v43 = vcvt.s32.f32 %v992_v41 }
 0xb17   : > { %996 = vmin.xlane.f32.xlu1 %v995_v40 }
 0xba4   : > { %v997_v42 = vpop.xlane.xlu1 %996 }
 0xba5   : > { %vm998_vm8 = vcmp.eq.f32.partialorder %v995_v40, %v997_v42  ;;  %v1003_v45 = vcvt.f32.s32 %v997_v42 }
 0xba6   : > { %v999_v44 = vsel %vm998_vm8, %v994_v43, inf }
 0xba7   : > { %1000 = vmin.xlane.f32.xlu0 %v999_v44  ;;  %v1004_v47 = vshll.u32 %v1003_v45, 16 }
 0xc34   : > { %v1001_v46 = vpop.xlane.xlu0 %1000 }
 0xc35   : > { %v1002_v48 = vcvt.f32.s32 %v1001_v46 }
 0xc37   : > { %v1005_v8 = vadd.s32 %v1004_v47, %v1002_v48 }
 0xc39   : > { %vm1006_vm9 = vcmp.eq.s32.totalorder %v2229_v57, %v1005_v8  ;;  %vm1007_vm10 = vcmp.eq.s32.totalorder %v2379_v27, %v1005_v8 }
 0xc3a   : > { %v1745_v9 = vsel %vm1006_vm9, 1.0, %v2046_v59  ;;  %v1746_v49 = vsel %vm1007_vm10, 1.0, %v2046_v59  ;;  %v1014_v50 = vsel %vm1006_vm9, -inf, %v981_v32  ;;  %v1015_v51 = vsel %vm1007_vm10, -inf, %v982_v29 }
 0xc3b   : > { %v1012_v21 = vadd.f32 %v1745_v9, %v979_v34  ;;  %v1013_v52 = vadd.f32 %v1746_v49, %v980_v35  ;;  %v1016_v54 = vmax.f32 %v1014_v50, %v1015_v51 }
 0xc3d   : > { %1017 = vmax.xlane.f32.xlu1 %v1016_v54 }
 0xcca   : > { %v1018_v18 = vpop.xlane.xlu1 %1017 }
 0xccb   : > { %vm1019_vm11 = vcmp.eq.f32.partialorder %v1014_v50, %v1018_v18  ;;  %vm1020_vm12 = vcmp.eq.f32.partialorder %v1015_v51, %v1018_v18 }
 0xccc   : > { %v1021_v55 = vsel %vm1019_vm11, %v2229_v57, 256  ;;  %v1022_v60 = vsel %vm1020_vm12, %v2379_v27, 256 }
 0xccd   : > { %vm1023_vm13 = vcmp.lt.s32.totalorder %v1021_v55, %v1022_v60 }
 0xcce   : > { %v1024_v0 = vsel %vm1023_vm13, %v1021_v55, %v1022_v60 }
 0xccf   : > { %v1026_v4 = vshra.s32 %v1024_v0, 16  ;;  %v1025_v16 = vand.u32 65535, %v1024_v0 }
 0xcd1   : > { %v1028_v5 = vcvt.s32.f32 %v1026_v4  ;;  %v1027_v56 = vcvt.s32.f32 %v1025_v16 }
 0xcd3   : > { %1029 = vmin.xlane.f32.xlu0 %v1028_v5 }
 0xd60   : > { %v1030_v2 = vpop.xlane.xlu0 %1029 }
 0xd61   : > { %vm1031_vm14 = vcmp.eq.f32.partialorder %v1028_v5, %v1030_v2  ;;  %v1036_v14 = vcvt.f32.s32 %v1030_v2 }
 0xd62   : > { %v1032_v17 = vsel %vm1031_vm14, %v1027_v56, inf }
 0xd63   : > { %1033 = vmin.xlane.f32.xlu1 %v1032_v17  ;;  %v1037_v3 = vshll.u32 %v1036_v14, 16 }
 0xdf0   : > { %v1034_v19 = vpop.xlane.xlu1 %1033 }
 0xdf1   : > { %v1035_v11 = vcvt.f32.s32 %v1034_v19 }
 0xdf3   : > { %v1038_v20 = vadd.s32 %v1037_v3, %v1035_v11 }
 0xdf5   : > { %vm1039_vm15 = vcmp.eq.s32.totalorder %v2229_v57, %v1038_v20  ;;  %vm1040_vm0 = vcmp.eq.s32.totalorder %v2379_v27, %v1038_v20 }
 0xdf6   : > { %v1747_v22 = vsel %vm1039_vm15, 1.0, %v2046_v59  ;;  %v1748_v25 = vsel %vm1040_vm0, 1.0, %v2046_v59  ;;  %v1047_v31 = vsel %vm1039_vm15, -inf, %v1014_v50  ;;  %v1048_v6 = vsel %vm1040_vm0, -inf, %v1015_v51 }
 0xdf7   : > { %v1045_v7 = vadd.f32 %v1747_v22, %v1012_v21  ;;  %v1046_v62 = vadd.f32 %v1748_v25, %v1013_v52  ;;  %v1049_v28 = vmax.f32 %v1047_v31, %v1048_v6 }
 0xdf9   : > { %1050 = vmax.xlane.f32.xlu0 %v1049_v28 }
 0xe86   : > { %v1051_v32 = vpop.xlane.xlu0 %1050 }
 0xe87   : > { %vm1052_vm1 = vcmp.eq.f32.partialorder %v1047_v31, %v1051_v32  ;;  %vm1053_vm2 = vcmp.eq.f32.partialorder %v1048_v6, %v1051_v32 }
 0xe88   : > { %v1054_v29 = vsel %vm1052_vm1, %v2229_v57, 256  ;;  %v1055_v34 = vsel %vm1053_vm2, %v2379_v27, 256 }
 0xe89   : > { %vm1056_vm3 = vcmp.lt.s32.totalorder %v1054_v29, %v1055_v34 }
 0xe8a   : > { %v1057_v35 = vsel %vm1056_vm3, %v1054_v29, %v1055_v34 }
 0xe8b   : > { %v1059_v26 = vshra.s32 %v1057_v35, 16  ;;  %v1058_v36 = vand.u32 65535, %v1057_v35 }
 0xe8d   : > { %v1061_v30 = vcvt.s32.f32 %v1059_v26  ;;  %v1060_v38 = vcvt.s32.f32 %v1058_v36 }
 0xe8f   : > { %1062 = vmin.xlane.f32.xlu1 %v1061_v30 }
 0xf1c   : > { %v1063_v37 = vpop.xlane.xlu1 %1062 }
 0xf1d   : > { %vm1064_vm4 = vcmp.eq.f32.partialorder %v1061_v30, %v1063_v37  ;;  %v1069_v40 = vcvt.f32.s32 %v1063_v37 }
 0xf1e   : > { %v1065_v39 = vsel %vm1064_vm4, %v1060_v38, inf }
 0xf1f   : > { %1066 = vmin.xlane.f32.xlu0 %v1065_v39  ;;  %v1070_v42 = vshll.u32 %v1069_v40, 16 }
 0xfac   : > { %v1067_v41 = vpop.xlane.xlu0 %1066 }
 0xfad   : > { %v1068_v43 = vcvt.f32.s32 %v1067_v41 }
 0xfaf   : > { %v1071_v44 = vadd.s32 %v1070_v42, %v1068_v43 }
 0xfb1   : > { %vm1072_vm5 = vcmp.eq.s32.totalorder %v2229_v57, %v1071_v44  ;;  %vm1073_vm6 = vcmp.eq.s32.totalorder %v2379_v27, %v1071_v44 }
 0xfb2   : > { %v1749_v45 = vsel %vm1072_vm5, 1.0, %v2046_v59  ;;  %v1750_v46 = vsel %vm1073_vm6, 1.0, %v2046_v59  ;;  %v1080_v47 = vsel %vm1072_vm5, -inf, %v1047_v31  ;;  %v1081_v48 = vsel %vm1073_vm6, -inf, %v1048_v6 }
 0xfb3   : > { %v1078_v8 = vadd.f32 %v1749_v45, %v1045_v7  ;;  %v1079_v9 = vadd.f32 %v1750_v46, %v1046_v62  ;;  %v1082_v49 = vmax.f32 %v1080_v47, %v1081_v48 }
 0xfb5   : > { %1083 = vmax.xlane.f32.xlu1 %v1082_v49 }
0x1042   : > { %v1084_v50 = vpop.xlane.xlu1 %1083 }
0x1043   : > { %vm1085_vm7 = vcmp.eq.f32.partialorder %v1080_v47, %v1084_v50  ;;  %vm1086_vm8 = vcmp.eq.f32.partialorder %v1081_v48, %v1084_v50 }
0x1044   : > { %v1087_v51 = vsel %vm1085_vm7, %v2229_v57, 256  ;;  %v1088_v21 = vsel %vm1086_vm8, %v2379_v27, 256 }
0x1045   : > { %vm1089_vm9 = vcmp.lt.s32.totalorder %v1087_v51, %v1088_v21 }
0x1046   : > { %v1090_v52 = vsel %vm1089_vm9, %v1087_v51, %v1088_v21 }
0x1047   : > { %v1092_v54 = vshra.s32 %v1090_v52, 16  ;;  %v1091_v55 = vand.u32 65535, %v1090_v52 }
0x1049   : > { %v1094_v18 = vcvt.s32.f32 %v1092_v54  ;;  %v1093_v0 = vcvt.s32.f32 %v1091_v55 }
0x104b   : > { %1095 = vmin.xlane.f32.xlu0 %v1094_v18 }
0x10d8   : > { %v1096_v60 = vpop.xlane.xlu0 %1095 }
0x10d9   : > { %vm1097_vm10 = vcmp.eq.f32.partialorder %v1094_v18, %v1096_v60  ;;  %v1102_v5 = vcvt.f32.s32 %v1096_v60 }
0x10da   : > { %v1098_v4 = vsel %vm1097_vm10, %v1093_v0, inf }
0x10db   : > { %1099 = vmin.xlane.f32.xlu1 %v1098_v4  ;;  %v1103_v2 = vshll.u32 %v1102_v5, 16 }
0x1168   : > { %v1100_v16 = vpop.xlane.xlu1 %1099 }
0x1169   : > { %v1101_v56 = vcvt.f32.s32 %v1100_v16 }
0x116b   : > { %v1104_v17 = vadd.s32 %v1103_v2, %v1101_v56 }
0x116d   : > { %vm1105_vm11 = vcmp.eq.s32.totalorder %v2229_v57, %v1104_v17  ;;  %vm1106_vm12 = vcmp.eq.s32.totalorder %v2379_v27, %v1104_v17 }
0x116e   : > { %v1751_v14 = vsel %vm1105_vm11, 1.0, %v2046_v59  ;;  %v1752_v19 = vsel %vm1106_vm12, 1.0, %v2046_v59  ;;  %v1113_v3 = vsel %vm1105_vm11, -inf, %v1080_v47  ;;  %v1114_v11 = vsel %vm1106_vm12, -inf, %v1081_v48 }
0x116f   : > { %v1111_v20 = vadd.f32 %v1751_v14, %v1078_v8  ;;  %v1112_v22 = vadd.f32 %v1752_v19, %v1079_v9  ;;  %v1115_v25 = vmax.f32 %v1113_v3, %v1114_v11 }
0x1171   : > { %1116 = vmax.xlane.f32.xlu0 %v1115_v25 }
0x11fe   : > { %v1117_v31 = vpop.xlane.xlu0 %1116 }
0x11ff   : > { %vm1118_vm13 = vcmp.eq.f32.partialorder %v1113_v3, %v1117_v31  ;;  %vm1119_vm14 = vcmp.eq.f32.partialorder %v1114_v11, %v1117_v31 }
0x1200   : > { %v1120_v6 = vsel %vm1118_vm13, %v2229_v57, 256  ;;  %v1121_v7 = vsel %vm1119_vm14, %v2379_v27, 256 }
0x1201   : > { %vm1122_vm15 = vcmp.lt.s32.totalorder %v1120_v6, %v1121_v7 }
0x1202   : > { %v1123_v62 = vsel %vm1122_vm15, %v1120_v6, %v1121_v7 }
0x1203   : > { %v1125_v28 = vshra.s32 %v1123_v62, 16  ;;  %v1124_v29 = vand.u32 65535, %v1123_v62 }
0x1205   : > { %v1127_v32 = vcvt.s32.f32 %v1125_v28  ;;  %v1126_v35 = vcvt.s32.f32 %v1124_v29 }
0x1207   : > { %1128 = vmin.xlane.f32.xlu1 %v1127_v32 }
0x1294   : > { %v1129_v34 = vpop.xlane.xlu1 %1128 }
0x1295   : > { %vm1130_vm0 = vcmp.eq.f32.partialorder %v1127_v32, %v1129_v34  ;;  %v1135_v30 = vcvt.f32.s32 %v1129_v34 }
0x1296   : > { %v1131_v26 = vsel %vm1130_vm0, %v1126_v35, inf }
0x1297   : > { %1132 = vmin.xlane.f32.xlu0 %v1131_v26  ;;  %v1136_v37 = vshll.u32 %v1135_v30, 16 }
0x1324   : > { %v1133_v36 = vpop.xlane.xlu0 %1132 }
0x1325   : > { %v1134_v38 = vcvt.f32.s32 %v1133_v36 }
0x1327   : > { %v1137_v39 = vadd.s32 %v1136_v37, %v1134_v38 }
0x1329   : > { %vm1138_vm1 = vcmp.eq.s32.totalorder %v2229_v57, %v1137_v39  ;;  %vm1139_vm2 = vcmp.eq.s32.totalorder %v2379_v27, %v1137_v39 }
0x132a   : > { %v1753_v40 = vsel %vm1138_vm1, 1.0, %v2046_v59  ;;  %v1754_v41 = vsel %vm1139_vm2, 1.0, %v2046_v59  ;;  %v1146_v42 = vsel %vm1138_vm1, -inf, %v1113_v3  ;;  %v1147_v43 = vsel %vm1139_vm2, -inf, %v1114_v11 }
0x132b   : > { %v1144_v44 = vadd.f32 %v1753_v40, %v1111_v20  ;;  %v1145_v45 = vadd.f32 %v1754_v41, %v1112_v22  ;;  %v1148_v46 = vmax.f32 %v1146_v42, %v1147_v43 }
0x132d   : > { %1149 = vmax.xlane.f32.xlu1 %v1148_v46 }
0x13ba   : > { %v1150_v47 = vpop.xlane.xlu1 %1149 }
0x13bb   : > { %vm1151_vm3 = vcmp.eq.f32.partialorder %v1146_v42, %v1150_v47  ;;  %vm1152_vm4 = vcmp.eq.f32.partialorder %v1147_v43, %v1150_v47 }
0x13bc   : > { %v1153_v48 = vsel %vm1151_vm3, %v2229_v57, 256  ;;  %v1154_v8 = vsel %vm1152_vm4, %v2379_v27, 256 }
0x13bd   : > { %vm1155_vm5 = vcmp.lt.s32.totalorder %v1153_v48, %v1154_v8 }
0x13be   : > { %v1156_v9 = vsel %vm1155_vm5, %v1153_v48, %v1154_v8 }
0x13bf   : > { %v1158_v49 = vshra.s32 %v1156_v9, 16  ;;  %v1157_v51 = vand.u32 65535, %v1156_v9 }
0x13c1   : > { %v1160_v50 = vcvt.s32.f32 %v1158_v49  ;;  %v1159_v52 = vcvt.s32.f32 %v1157_v51  ;;  %v1267_v51 = vrot.slane %v2364_v53, 4 }
0x13c3   : > { %1161 = vmin.xlane.f32.xlu0 %v1160_v50 }
0x1450   : > { %v1162_v21 = vpop.xlane.xlu0 %1161 }
0x1451   : > { %vm1163_vm6 = vcmp.eq.f32.partialorder %v1160_v50, %v1162_v21  ;;  %v1168_v18 = vcvt.f32.s32 %v1162_v21  ;;  %v1261_v50 = vrot.slane %v2362_v13, 4 }
0x1452   : > { %v1164_v54 = vsel %vm1163_vm6, %v1159_v52, inf  ;;  %v1268_v52 = vmax.f32 %v2364_v53, %v1267_v51 }
0x1453   : > { %1165 = vmin.xlane.f32.xlu1 %v1164_v54  ;;  %v1169_v60 = vshll.u32 %v1168_v18, 16  ;;  %v1262_v21 = vmax.f32 %v2362_v13, %v1261_v50 }
0x1454   : > { %v1269_v18 = vrot.slane %v1268_v52, 2 }
0x1455   : > { %v1263_v54 = vrot.slane %v1262_v21, 2 }
0x14e0   : > { %v1166_v55 = vpop.xlane.xlu1 %1165 }
0x14e1   : > { %v1167_v0 = vcvt.f32.s32 %v1166_v55  ;;  %v1264_v55 = vmax.f32 %v1262_v21, %v1263_v54 }
0x14e3   : > { %v1170_v4 = vadd.s32 %v1169_v60, %v1167_v0  ;;  %v1270_v60 = vmax.f32 %v1268_v52, %v1269_v18  ;;  %v1265_v0 = vrot.slane %v1264_v55, 1 }
0x14e5   : > { %vm1171_vm7 = vcmp.eq.s32.totalorder %v2229_v57, %v1170_v4  ;;  %vm1172_vm8 = vcmp.eq.s32.totalorder %v2379_v27, %v1170_v4  ;;  %v1271_v4 = vrot.slane %v1270_v60, 1 }
0x14e6   : > { %v1755_v5 = vsel %vm1171_vm7, 1.0, %v2046_v59  ;;  %v1756_v16 = vsel %vm1172_vm8, 1.0, %v2046_v59  ;;  %v1179_v2 = vsel %vm1171_vm7, -inf, %v1146_v42  ;;  %v1180_v56 = vsel %vm1172_vm8, -inf, %v1147_v43 }
0x14e7   : > { %v1177_v17 = vadd.f32 %v1755_v5, %v1144_v44  ;;  %v1178_v14 = vadd.f32 %v1756_v16, %v1145_v45  ;;  %v1181_v19 = vmax.f32 %v1179_v2, %v1180_v56  ;;  %v1266_v5 = vmax.f32 %v1264_v55, %v1265_v0 }
0x14e8   : > { %v1272_v16 = vmax.f32 %v1270_v60, %v1271_v4 }
0x14e9   : > { %1182 = vmax.xlane.f32.xlu0 %v1181_v19  ;;  %vm1273_vm3 = vcmp.eq.f32.partialorder %v2362_v13, %v1266_v5 }
0x14ea   : > { %vm1274_vm4 = vcmp.eq.f32.partialorder %v2364_v53, %v1272_v16 }
0x1576   : > { %v1183_v3 = vpop.xlane.xlu0 %1182 }
0x1577   : > { %vm1184_vm9 = vcmp.eq.f32.partialorder %v1179_v2, %v1183_v3  ;;  %vm1185_vm10 = vcmp.eq.f32.partialorder %v1180_v56, %v1183_v3 }
0x1578   : > { %v1186_v11 = vsel %vm1184_vm9, %v2229_v57, 256  ;;  %v1187_v20 = vsel %vm1185_vm10, %v2379_v27, 256 }
0x1579   : > { %vm1188_vm11 = vcmp.lt.s32.totalorder %v1186_v11, %v1187_v20 }
0x157a   : > { %v1189_v22 = vsel %vm1188_vm11, %v1186_v11, %v1187_v20 }
0x157b   : > { %v1191_v25 = vshra.s32 %v1189_v22, 16  ;;  %v1190_v6 = vand.u32 65535, %v1189_v22 }
0x157d   : > { %v1193_v31 = vcvt.s32.f32 %v1191_v25  ;;  %v1192_v62 = vcvt.s32.f32 %v1190_v6 }
0x157f   : > { %1194 = vmin.xlane.f32.xlu1 %v1193_v31 }
0x160c   : > { %v1195_v7 = vpop.xlane.xlu1 %1194 }
0x160d   : > { %vm1196_vm12 = vcmp.eq.f32.partialorder %v1193_v31, %v1195_v7  ;;  %v1201_v32 = vcvt.f32.s32 %v1195_v7 }
0x160e   : > { %v1197_v28 = vsel %vm1196_vm12, %v1192_v62, inf }
0x160f   : > { %1198 = vmin.xlane.f32.xlu0 %v1197_v28  ;;  %v1202_v34 = vshll.u32 %v1201_v32, 16 }
0x169c   : > { %v1199_v29 = vpop.xlane.xlu0 %1198 }
0x169d   : > { %v1200_v35 = vcvt.f32.s32 %v1199_v29 }
0x169f   : > { %v1203_v26 = vadd.s32 %v1202_v34, %v1200_v35 }
0x16a1   : > { %vm1204_vm13 = vcmp.eq.s32.totalorder %v2229_v57, %v1203_v26  ;;  %vm1205_vm14 = vcmp.eq.s32.totalorder %v2379_v27, %v1203_v26 }
0x16a2   : > { %v1758_v30 = vsel %vm1205_vm14, 1.0, %v2046_v59  ;;  %v1212_v36 = vsel %vm1204_vm13, -inf, %v1179_v2  ;;  %v1213_v37 = vsel %vm1205_vm14, -inf, %v1180_v56  ;;  %v1757_v38 = vsel %vm1204_vm13, 1.0, %v2046_v59 }
0x16a3   : > { %v1211_v39 = vadd.f32 %v1758_v30, %v1178_v14  ;;  %v1214_v40 = vmax.f32 %v1212_v36, %v1213_v37  ;;  %v1210_v41 = vadd.f32 %v1757_v38, %v1177_v17  ;;  %v1275_v2 = vsel %vm1273_vm3, %v2260_v12, 8 }
0x16a4   : > { %v1276_v56 = vsel %vm1274_vm4, %v2260_v12, 8  ;;  %v1277_v17 = vrot.slane %v1275_v2, 4 }
0x16a5   : > { %1215 = vmax.xlane.f32.xlu1 %v1214_v40  ;;  %v1286_v14 = vrot.slane %v1276_v56, 4 }
0x16a6   : > { %vm1278_vm5 = vcmp.lt.s32.totalorder %v1275_v2, %v1277_v17 }
0x16a7   : > { %vm1287_vm6 = vcmp.lt.s32.totalorder %v1276_v56, %v1286_v14  ;;  %v1279_v3 = vsel %vm1278_vm5, %v1275_v2, %v1277_v17 }
0x16a8   : > { %v1288_v11 = vsel %vm1287_vm6, %v1276_v56, %v1286_v14  ;;  %v1280_v22 = vrot.slane %v1279_v3, 2 }
0x16a9   : > { %v1289_v25 = vrot.slane %v1288_v11, 2 }
0x16aa   : > { %vm1281_vm7 = vcmp.lt.s32.totalorder %v1279_v3, %v1280_v22 }
0x16ab   : > { %vm1290_vm8 = vcmp.lt.s32.totalorder %v1288_v11, %v1289_v25  ;;  %v1282_v34 = vsel %vm1281_vm7, %v1279_v3, %v1280_v22 }
0x16ac   : > { %v1291_v35 = vsel %vm1290_vm8, %v1288_v11, %v1289_v25 }
0x1732   : > { %v1216_v42 = vpop.xlane.xlu1 %1215 }
0x1733   : > { %vm1217_vm15 = vcmp.eq.f32.partialorder %v1212_v36, %v1216_v42  ;;  %vm1218_vm0 = vcmp.eq.f32.partialorder %v1213_v37, %v1216_v42  ;;  %v1283_v36 = vrot.slane %v1282_v34, 1  ;;  %v1292_v37 = vrot.slane %v1291_v35, 1 }
0x1734   : > { %v1219_v43 = vsel %vm1217_vm15, %v2229_v57, 256  ;;  %v1220_v44 = vsel %vm1218_vm0, %v2379_v27, 256 }
0x1735   : > { %vm1221_vm1 = vcmp.lt.s32.totalorder %v1219_v43, %v1220_v44  ;;  %vm1284_vm11 = vcmp.lt.s32.totalorder %v1282_v34, %v1283_v36  ;;  %vm1293_vm12 = vcmp.lt.s32.totalorder %v1291_v35, %v1292_v37 }
0x1736   : > { %v1222_v45 = vsel %vm1221_vm1, %v1219_v43, %v1220_v44 }
0x1737   : > { %v1224_v46 = vshra.s32 %v1222_v45, 16  ;;  %v1223_v48 = vand.u32 65535, %v1222_v45 }
0x1739   : > { %v1226_v47 = vcvt.s32.f32 %v1224_v46  ;;  %v1225_v9 = vcvt.s32.f32 %v1223_v48 }
0x173b   : > { %1227 = vmin.xlane.f32.xlu0 %v1226_v47 }
0x17c8   : > { %v1228_v8 = vpop.xlane.xlu0 %1227 }
0x17c9   : > { %vm1229_vm2 = vcmp.eq.f32.partialorder %v1226_v47, %v1228_v8  ;;  %v1234_v19 = vcvt.f32.s32 %v1228_v8 }
0x17ca   : > { %v1230_v49 = vsel %vm1229_vm2, %v1225_v9, inf }
0x17cb   : > { %1231 = vmin.xlane.f32.xlu1 %v1230_v49  ;;  %v1235_v31 = vshll.u32 %v1234_v19, 16 }
0x1858   : > { %v1232_v20 = vpop.xlane.xlu1 %1231 }
0x1859   : > { %v1233_v6 = vcvt.f32.s32 %v1232_v20 }
0x185b   : > { %v1236_v7 = vadd.s32 %v1235_v31, %v1233_v6 }
0x185d   : > { %vm1237_vm9 = vcmp.eq.s32.totalorder %v2229_v57, %v1236_v7  ;;  %vm1238_vm10 = vcmp.eq.s32.totalorder %v2379_v27, %v1236_v7 }
0x185e   : > { %v1759_v62 = vsel %vm1237_vm9, 1.0, %v2046_v59  ;;  %v1760_v28 = vsel %vm1238_vm10, 1.0, %v2046_v59 }
0x185f   : > { %v1243_v32 = vadd.f32 %v1759_v62, %v1210_v41  ;;  %v1244_v29 = vadd.f32 %v1760_v28, %v1211_v39  ;;  %v1285_v41 = vsel %vm1284_vm11, %v1282_v34, %v1283_v36  ;;  %v1294_v39 = vsel %vm1293_vm12, %v1291_v35, %v1292_v37 }
0x1860   : > { %vm1295_vm13 = vcmp.eq.s32.totalorder %v2260_v12, %v1285_v41  ;;  %vm1296_vm14 = vcmp.eq.s32.totalorder %v2260_v12, %v1294_v39 }
0x1861   : > { %v1245_v26 = vmul.f32 %v1243_v32, %v2356_v63  ;;  %v1246_v30 = vmul.f32 %v1244_v29, %v2358_v1  ;;  %v1761_v48 = vsel %vm1295_vm13, 1.0, %v2046_v59  ;;  %v1762_v8 = vsel %vm1296_vm14, 1.0, %v2046_v59 }
0x1862   : > { %vm1435_vm13 = vcmask 1040384   ;;  %vm1438_vm14 = vcmask 1041408  }
0x1863   : > { %v1247_v38 = vrot.slane %v1245_v26, 4  ;;  %v1253_v40 = vrot.slane %v1246_v30, 4 }
0x1865   : > { %v1248_v42 = vadd.f32 %v1247_v38, %v1245_v26  ;;  %v1254_v57 = vadd.f32 %v1253_v40, %v1246_v30 }
0x1867   : > { %v1249_v27 = vrot.slane %v1248_v42, 2  ;;  %v1255_v43 = vrot.slane %v1254_v57, 2 }
0x1869   : > { %v1250_v44 = vadd.f32 %v1249_v27, %v1248_v42  ;;  %v1256_v45 = vadd.f32 %v1255_v43, %v1254_v57 }
0x186b   : > { %v1251_v46 = vrot.slane %v1250_v44, 1  ;;  %v1257_v47 = vrot.slane %v1256_v45, 1 }
0x186d   : > { %v1252_v63 = vadd.f32 %v1251_v46, %v1250_v44  ;;  %v1258_v1 = vadd.f32 %v1257_v47, %v1256_v45 }
0x186f   : > { %vm1301_vm15 = vcmp.gt.f32.partialorder %v1252_v63, 1.0  ;;  %vm1302_vm0 = vcmp.gt.f32.partialorder %v1258_v1, 1.0 }
0x1870   : > { %v1307_v9 = vsel %vm1301_vm15, %v1761_v48, %v1245_v26  ;;  %v1308_v49 = vsel %vm1302_vm0, %v1762_v8, %v1246_v30  ;;  %vm1441_vm15 = vcmask 1042432  }
0x1871   : > { %v1315_v50 = vrot.slane %v1308_v49, 4  ;;  %v1449_v51 = vmul.f32 %v1307_v9, %v2362_v13  ;;  %v1450_v21 = vmul.f32 %v1308_v49, %v2364_v53  ;;  %v1309_v52 = vrot.slane %v1307_v9, 4 }
0x1872   : > { %v2488_v54 = vmul.f32 %v1307_v9, %v2372_v61  ;;  %v2491_v18 = vmul.f32 %v1308_v49, %v2374_v23 }
0x1873   : > { %v1328_v55 = vmax.f32 %v1308_v49, %v1315_v50  ;;  %v1451_v60 = vmax.f32 %v1449_v51, %v1450_v21  ;;  %v1322_v0 = vmax.f32 %v1307_v9, %v1309_v52  ;;  %v1310_v61 = vadd.f32 %v1309_v52, %v1307_v9 }
0x1874   : > { %v1446_v4 = vmax.f32 %v2488_v54, %v2491_v18  ;;  %v1316_v19 = vadd.f32 %v1315_v50, %v1308_v49 }
0x1875   : > { %v1329_v5 = vrot.slane %v1328_v55, 2  ;;  %1452 = vmax.xlane.f32.xlu1 %v1451_v60  ;;  %v1323_v16 = vrot.slane %v1322_v0, 2  ;;  %v1311_v20 = vrot.slane %v1310_v61, 2 }
0x1876   : > { %1447 = vmax.xlane.f32.xlu0 %v1446_v4  ;;  %v1317_v31 = vrot.slane %v1316_v19, 2 }
0x1877   : > { %v1330_v13 = vmax.f32 %v1328_v55, %v1329_v5  ;;  %v1324_v2 = vmax.f32 %v1322_v0, %v1323_v16  ;;  %v1312_v62 = vadd.f32 %v1311_v20, %v1310_v61 }
0x1878   : > { %v1318_v29 = vadd.f32 %v1317_v31, %v1316_v19 }
0x1879   : > { %v1331_v53 = vrot.slane %v1330_v13, 1  ;;  %v1325_v56 = vrot.slane %v1324_v2, 1  ;;  %v1313_v26 = vrot.slane %v1312_v62, 1 }
0x187a   : > { %v1319_v37 = vrot.slane %v1318_v29, 1 }
0x187b   : > { %v1332_v17 = vmax.f32 %v1330_v13, %v1331_v53  ;;  %v1326_v14 = vmax.f32 %v1324_v2, %v1325_v56  ;;  %v2503_v40 = vadd.f32 %v1313_v26, %v1312_v62 }
0x187c   : > { %v2517_v56 = vadd.f32 %v1319_v37, %v1318_v29 }
0x187d   : > { %vm1334_vm1 = vcmp.eq.f32.partialorder %v1308_v49, %v1332_v17  ;;  %vm1333_vm2 = vcmp.eq.f32.partialorder %v1307_v9, %v1326_v14  ;;  %v1862_v31 = vtrunc.f32 %v2503_v40 }
0x187e   : > { %v1336_v23 = vsel %vm1334_vm1, %v2260_v12, 8  ;;  %v1335_v11 = vsel %vm1333_vm2, %v2260_v12, 8  ;;  %v1864_v62 = vtrunc.f32 %v2517_v56 }
0x187f   : > { %v1346_v3 = vrot.slane %v1336_v23, 4  ;;  %v1337_v22 = vrot.slane %v1335_v11, 4 }
0x1881   : > { %vm1347_vm3 = vcmp.lt.s32.totalorder %v1336_v23, %v1346_v3  ;;  %vm1338_vm4 = vcmp.lt.s32.totalorder %v1335_v11, %v1337_v22 }
0x1882   : > { %v1348_v25 = vsel %vm1347_vm3, %v1336_v23, %v1346_v3  ;;  %v1339_v6 = vsel %vm1338_vm4, %v1335_v11, %v1337_v22 }
0x1883   : > { %v1349_v7 = vrot.slane %v1348_v25, 2  ;;  %v1340_v28 = vrot.slane %v1339_v6, 2 }
0x1885   : > { %vm1350_vm5 = vcmp.lt.s32.totalorder %v1348_v25, %v1349_v7  ;;  %vm1341_vm6 = vcmp.lt.s32.totalorder %v1339_v6, %v1340_v28 }
0x1886   : > { %v1351_v32 = vsel %vm1350_vm5, %v1348_v25, %v1349_v7  ;;  %v1342_v34 = vsel %vm1341_vm6, %v1339_v6, %v1340_v28 }
0x1887   : > { %v1352_v35 = vrot.slane %v1351_v32, 1  ;;  %v1343_v30 = vrot.slane %v1342_v34, 1 }
0x1889   : > { %vm1353_vm7 = vcmp.lt.s32.totalorder %v1351_v32, %v1352_v35  ;;  %vm1344_vm8 = vcmp.lt.s32.totalorder %v1342_v34, %v1343_v30 }
0x188a   : > { %v2497_v36 = vsel %vm1353_vm7, %v1351_v32, %v1352_v35  ;;  %v2499_v38 = vsel %vm1344_vm8, %v1342_v34, %v1343_v30 }
0x188b   : > { %vm1356_vm9 = vcmp.eq.s32.totalorder %v2260_v12, %v2497_v36  ;;  %vm1355_vm10 = vcmp.eq.s32.totalorder %v2260_v12, %v2499_v38 }
0x188c   : > { %v1764_v42 = vsel %vm1356_vm9, 1.0, %v2046_v59  ;;  %v1362_v57 = vsel %vm1356_vm9, %v2231_v58, 0  ;;  %v1763_v27 = vsel %vm1355_vm10, 1.0, %v2046_v59  ;;  %v1361_v43 = vsel %vm1355_vm10, %v2231_v58, 0 }
0x188d   : > { %v1369_v44 = vrot.slane %v1362_v57, 4  ;;  %v1380_v45 = vmul.f32 %v1764_v42, %v2256_v10  ;;  %v1363_v41 = vrot.slane %v1361_v43, 4  ;;  %v1379_v39 = vmul.f32 %v1763_v27, %v2256_v10 }
0x188e   : > { %v1393_v46 = vmul.f32 %v1763_v27, %v2282_v24  ;;  %v1394_v47 = vmul.f32 %v1764_v42, %v2282_v24  ;;  %v1407_v48 = vmul.f32 %v1763_v27, %v2264_v15  ;;  %v1408_v8 = vmul.f32 %v1764_v42, %v2264_v15 }
0x188f   : > { %v1370_v63 = vadd.s32 %v1369_v44, %v1362_v57  ;;  %v1387_v1 = vrot.slane %v1380_v45, 4  ;;  %v1364_v9 = vadd.s32 %v1363_v41, %v1361_v43  ;;  %v1381_v59 = vrot.slane %v1379_v39, 4 }
0x1890   : > { %v1395_v49 = vrot.slane %v1393_v46, 4  ;;  %v1401_v58 = vrot.slane %v1394_v47, 4  ;;  %v1409_v21 = vrot.slane %v1407_v48, 4  ;;  %v1415_v52 = vrot.slane %v1408_v8, 4 }
0x1891   : > { %v1371_v50 = vrot.slane %v1370_v63, 2  ;;  %v1388_v51 = vadd.f32 %v1387_v1, %v1380_v45  ;;  %v1365_v55 = vrot.slane %v1364_v9, 2  ;;  %v1382_v10 = vadd.f32 %v1381_v59, %v1379_v39 }
0x1892   : > { %v1396_v60 = vadd.f32 %v1395_v49, %v1393_v46  ;;  %v1402_v0 = vadd.f32 %v1401_v58, %v1394_v47  ;;  %v1410_v5 = vadd.f32 %v1409_v21, %v1407_v48  ;;  %v1416_v16 = vadd.f32 %v1415_v52, %v1408_v8 }
0x1893   : > { %v1372_v4 = vadd.s32 %v1371_v50, %v1370_v63  ;;  %v1389_v24 = vrot.slane %v1388_v51, 2  ;;  %v1366_v13 = vadd.s32 %v1365_v55, %v1364_v9  ;;  %v1383_v2 = vrot.slane %v1382_v10, 2 }
0x1894   : > { %v1397_v53 = vrot.slane %v1396_v60, 2  ;;  %v1403_v15 = vrot.slane %v1402_v0, 2  ;;  %v1411_v14 = vrot.slane %v1410_v5, 2  ;;  %v1417_v3 = vrot.slane %v1416_v16, 2 }
0x1895   : > { %v1373_v17 = vrot.slane %v1372_v4, 1  ;;  %v1390_v61 = vadd.f32 %v1389_v24, %v1388_v51  ;;  %v1367_v23 = vrot.slane %v1366_v13, 1  ;;  %v1384_v19 = vadd.f32 %v1383_v2, %v1382_v10 }
0x1896   : > { %v1398_v20 = vadd.f32 %v1397_v53, %v1396_v60  ;;  %v1404_v22 = vadd.f32 %v1403_v15, %v1402_v0  ;;  %v1412_v7 = vadd.f32 %v1411_v14, %v1410_v5  ;;  %v1418_v32 = vadd.f32 %v1417_v3, %v1416_v16 }
0x1897   : > { %v1374_v11 = vadd.s32 %v1373_v17, %v1372_v4  ;;  %v1368_v25 = vadd.s32 %v1367_v23, %v1366_v13  ;;  %v1391_v6 = vrot.slane %v1390_v61, 1  ;;  %v1385_v28 = vrot.slane %v1384_v19, 1 }
0x1898   : > { %v1399_v29 = vrot.slane %v1398_v20, 1  ;;  %v1405_v34 = vrot.slane %v1404_v22, 1  ;;  %v1421_v30 = vmul.f32 %v1763_v27, %v2298_v33  ;;  %v1422_v37 = vmul.f32 %v1764_v42, %v2298_v33 }
0x1899   : > { %vm1377_vm11 = vcmp.gt.s32.totalorder %v1374_v11, 0  ;;  %vm1375_vm12 = vcmp.gt.s32.totalorder %v1368_v25, 0  ;;  %v1392_v57 = vadd.f32 %v1391_v6, %v1390_v61  ;;  %v1413_v43 = vrot.slane %v1412_v7, 1 }
0x189a   : > { %v2521_v35 = vsel %vm1375_vm12, %v1368_v25, 0  ;;  %v2523_v26 = vsel %vm1377_vm11, %v1374_v11, 0  ;;  %v1863_v44 = vcvt.f32.s32 %v1862_v31  ;;  %v1865_v45 = vcvt.f32.s32 %v1864_v62 }
0x189b   : > { %v1386_v41 = vadd.f32 %v1385_v28, %v1384_v19  ;;  %v1419_v39 = vrot.slane %v1418_v32, 1  ;;  %v1423_v46 = vrot.slane %v1421_v30, 4  ;;  %v1429_v47 = vrot.slane %v1422_v37, 4 }
0x189c   : > { %v1400_v63 = vadd.f32 %v1399_v29, %v1398_v20  ;;  %v1406_v1 = vadd.f32 %v1405_v34, %v1404_v22  ;;  %v1496_v48 = vsel %vm1435_vm13, %v1863_v44, %v2521_v35  ;;  %v1497_v8 = vsel %vm1435_vm13, %v1865_v45, %v2523_v26 }
0x189d   : > { %v1424_v33 = vadd.f32 %v1423_v46, %v1421_v30  ;;  %v1430_v42 = vadd.f32 %v1429_v47, %v1422_v37  ;;  %v1498_v27 = vsel %vm1438_vm14, %v1496_v48, %v2499_v38  ;;  %v1499_v9 = vsel %vm1438_vm14, %v1497_v8, %v2497_v36 }
0x189e   : > { %v1500_v59 = vcombine.low %v1498_v27, %v1499_v9  ;;  %v1414_v50 = vadd.f32 %v1413_v43, %v1412_v7  ;;  %v1420_v51 = vadd.f32 %v1419_v39, %v1418_v32  ;;  %v1436_v55 = vsel %vm1435_vm13, %v1386_v41, %v1400_v63 }
0x189f   : > { %v1425_v49 = vrot.slane %v1424_v33, 2  ;;  %v1431_v58 = vrot.slane %v1430_v42, 2  ;;  %v1437_v38 = vsel %vm1435_vm13, %v1392_v57, %v1406_v1 }
0x18a0   : > { %1501 = vst [vmem:[%s309_s15] sm:$0x77] %v1500_v59  ;;  %v1439_v60 = vsel %vm1438_vm14, %v1436_v55, %v1414_v50  ;;  %v1440_v0 = vsel %vm1438_vm14, %v1437_v38, %v1420_v51 }
0x18a1   : > { %v1426_v21 = vadd.f32 %v1425_v49, %v1424_v33  ;;  %v1432_v52 = vadd.f32 %v1431_v58, %v1430_v42 }
0x18a3   : > { %v1427_v10 = vrot.slane %v1426_v21, 1  ;;  %v1433_v36 = vrot.slane %v1432_v52, 1 }
0x18a5   : > { %v1428_v4 = vadd.f32 %v1427_v10, %v1426_v21  ;;  %v1434_v24 = vadd.f32 %v1433_v36, %v1432_v52 }
0x18a7   : > { %v1442_v5 = vsel %vm1441_vm15, %v1439_v60, %v1428_v4  ;;  %v1443_v16 = vsel %vm1441_vm15, %v1440_v0, %v1434_v24 }
0x18a8   : > { %v1487_v13 = vcombine.low %v1442_v5, %v1443_v16 }
0x18aa   : > { %1489 = vst [vmem:[%s276_s17] sm:$0xff] %v1487_v13 }
0x18ab   : > { %1958 = shalt.err (!%p1955_p3)
}
0x18ac   : > { %s1959_s14 = scalar_lea.hbm %s2552_s26, 128  ;;  %s1963_s10 = scalar_lea.hbm %s2643_s4, 256 }
0x18ad   : > { %p1960_p4 = scmp.ne.s32.totalorder %s2552_s26, %s1959_s14  ;;  %p1964_p9 = scmp.lt.u32.totalorder %s2552_s26, %s2643_s4 }
0x18ae   : > { %p1965_p10 = scmp.lt.u32.totalorder %s1963_s10, %s1959_s14  ;;  %p1967_p12 = scmp.lt.u32.totalorder %s1959_s14, %s2552_s26 }
0x18af   : > { %p1961_p7 = pnand %p1960_p4, %p2128_p5 }
0x18b0   : > { %p1966_p11 = por %p1965_p10, %p1964_p9 }
0x18b1   : > { %p1962_p8 = pneg %p1961_p7 }
0x18b2   : > { %p1968_p13 = por %p1967_p12, %p1966_p11 }
0x18b4   : > { %p1969_p0 = pnand %p1968_p13, %p1962_p8 }
0x18b6   : > { %1972 = shalt.err (!%p1969_p0)
}
0x18b7   : > { %1866 = dma.vmem_to_hbm [thread:$0]  (%p2128_p5), %s2554_s18, 128, %s2552_s26, %s1503_s28   ;;  %v1476_v32 = vadd.s32 8, %v2260_v12  ;;  %vm1473_vm0 = vcmp.gt.f32.partialorder %v2517_v56, 0.0  ;;  %vm1472_vm1 = vcmp.gt.f32.partialorder %v2503_v40, 0.0  ;;  %vm1477_vm2 = vcmp.eq.s32.totalorder %v2260_v12, %v2521_v35 }
0x18b8   : > { %s1691_s20 = sshll.u32 %s2541_s16, 5  ;;  %s1777_s28 = sshll.u32 %s2111_s25, 9  ;;  %vm1478_vm3 = vcmp.eq.s32.totalorder %v2260_v12, %v2523_v26 }
0x18b9   : > { %s283_s18 = scalar_lea.vmem [#allocation4], %s1691_s20  ;;  %s2594_s25 = scalar_lea.hbm %s2644_s5, %s1777_s28  ;;  %vm1479_vm4 = vcmp.eq.s32.totalorder %v1476_v32, %v2521_v35  ;;  %vm1480_vm5 = vcmp.eq.s32.totalorder %v1476_v32, %v2523_v26 }
0x18ba   : > { %s1540_s26 = sshll.u32 %s283_s18, 4  ;;  %s1508_s12 = scalar_lea.sflag [#allocation5], %s2541_s16  ;;  %s2589_s26 = int_to_ptr.vmem [resolvable:$true] %s1540_s26 }
0x18bb   : > { %s1973_s13 = scalar_lea.vmem %s2589_s26, 512  ;;  %s2052_s14 = smov [#allocation4]  }
0x18bc   : > { %p1974_p1 = scmp.ne.s32.totalorder %s2589_s26, %s1973_s13  ;;  %s1977_s15 = sshll.u32 %s2052_s14, 4  ;;  %s1978_s15 = int_to_ptr.vmem [resolvable:$false] %s1977_s15 }
0x18bd   : > { %s1979_s9 = scalar_lea.vmem %s1978_s15, 1024  ;;  %p1980_p4 = scmp.lt.s32.totalorder %s2589_s26, %s1978_s15 }
0x18be   : > { %p1975_p2 = pnand %p1974_p1, %p2128_p5  ;;  %p1981_p7 = scmp.lt.s32.totalorder %s1979_s9, %s1973_s13 }
0x18c0   : > { %p1976_p3 = pneg %p1975_p2  ;;  %p1982_p8 = por %p1981_p7, %p1980_p4 }
0x18c2   : > { %p1983_p9 = pnand %p1982_p8, %p1976_p3 }
0x1902   : > { %v1453_v15 = vpop.xlane.xlu1 %1452 }
0x1903   : > { %v1448_v2 = vpop.xlane.xlu0 %1447  ;;  %v1454_v17 = vmul.f32 %v1453_v15, %v2488_v54  ;;  %v1455_v61 = vmul.f32 %v1453_v15, %v2491_v18 }
0x1904   : > { %v1456_v53 = vadd.f32 1e-09, %v1448_v2 }
0x1906   : > { %1943 = vrcp.f32 %v1456_v53 }
0x1910   : > { %v1944_v14 = vpop.eup %1943 }
0x1911   : > { %v1458_v23 = vmul.f32 %v1944_v14, %v1454_v17  ;;  %v1459_v19 = vmul.f32 %v1944_v14, %v1455_v61 }
0x1913   : > { %v1460_v3 = vrot.slane %v1458_v23, 4  ;;  %v1466_v11 = vrot.slane %v1459_v19, 4 }
0x1915   : > { %v1461_v20 = vmax.f32 %v1458_v23, %v1460_v3  ;;  %v1467_v22 = vmax.f32 %v1459_v19, %v1466_v11 }
0x1917   : > { %v1462_v25 = vrot.slane %v1461_v20, 2  ;;  %v1468_v31 = vrot.slane %v1467_v22, 2 }
0x1919   : > { %v1463_v6 = vmax.f32 %v1461_v20, %v1462_v25  ;;  %v1469_v7 = vmax.f32 %v1467_v22, %v1468_v31 }
0x191b   : > { %v1464_v62 = vrot.slane %v1463_v6, 1  ;;  %v1470_v28 = vrot.slane %v1469_v7, 1 }
0x191d   : > { %v1465_v54 = vmax.f32 %v1463_v6, %v1464_v62  ;;  %v1471_v18 = vmax.f32 %v1469_v7, %v1470_v28 }
0x191f   : > { %v1474_v56 = vsel %vm1472_vm1, %v1465_v54, 0.0  ;;  %v1475_v29 = vsel %vm1473_vm0, %v1471_v18, 0.0 }
0x1920   : > { %v1481_v40 = vsel %vm1477_vm2, %v1474_v56, 0.0  ;;  %v1482_v34 = vsel %vm1478_vm3, %v1475_v29, 0.0  ;;  %v1483_v12 = vsel %vm1479_vm4, %v1474_v56, 0.0  ;;  %v1484_v30 = vsel %vm1480_vm5, %v1475_v29, 0.0 }
0x1921   : > { %1490 = vst [vmem:[%s283_s18] sm:$0xff] %v1481_v40  ;;  %1491 = vst [vmem:[%s283_s18 + $0x8] sm:$0xff] %v1482_v34 }
0x1922   : > { %1492 = vst [vmem:[%s283_s18 + $0x10] sm:$0xff] %v1483_v12  ;;  %1493 = vst [vmem:[%s283_s18 + $0x18] sm:$0xff] %v1484_v30 }
0x1923   : > { %1986 = shalt.err (!%p1983_p9)
}
0x1924   : > { %s1987_s10 = scalar_lea.hbm %s2594_s25, 512  ;;  %s1991_s20 = scalar_lea.hbm %s2644_s5, 1024 }
0x1925   : > { %p1988_p10 = scmp.ne.s32.totalorder %s2594_s25, %s1987_s10  ;;  %p1992_p13 = scmp.lt.u32.totalorder %s2594_s25, %s2644_s5 }
0x1926   : > { %p1993_p0 = scmp.lt.u32.totalorder %s1991_s20, %s1987_s10  ;;  %p1995_p2 = scmp.lt.u32.totalorder %s1987_s10, %s2594_s25 }
0x1927   : > { %p1989_p11 = pnand %p1988_p10, %p2128_p5 }
0x1928   : > { %p1994_p1 = por %p1993_p0, %p1992_p13 }
0x1929   : > { %p1990_p12 = pneg %p1989_p11 }
0x192a   : > { %p1996_p3 = por %p1995_p2, %p1994_p1 }
0x192c   : > { %p1997_p4 = pnand %p1996_p3, %p1990_p12 }
0x192e   : > { %2000 = shalt.err (!%p1997_p4)
}
0x192f   : > { %s2053_s29 = smov 256   ;;  %s2054_s11 = smov 16  }
0x1930   : > { %1867 = dma.vmem_to_hbm [thread:$0]  (%p2128_p5), %s2589_s26, 512, %s2594_s25, %s1508_s12, %s2053_s29, %s2053_s29, %s2054_s11  }
0x1931 PF: > { %p1877_p7 = scmp.ge.s32.totalorder %s2039_s24, 2  ;;  %s1558_s13 = sand.u32 1, %s2027_s21  }
0x1932   : > { %s1559_s14 = scalar_lea.sflag [#allocation3], %s1558_s13 }
0x1933   : > { %p1871_p8 = pnand %p1877_p7, %p2132_p6 }
0x1935   : > { %2018 = dma.done.wait (!%p1871_p8), %s1559_s14, 128  }
0x1936   : > { %2020 = vsyncadd (!%p1871_p8), %s1559_s14, 4294967168  ;;  %s1568_s15 = scalar_lea.sflag [#allocation5], %s1558_s13 }
0x1937   : > { %2022 = dma.done.wait (!%p1871_p8), %s1568_s15, 512  }
0x1938   : > { %2024 = vsyncadd (!%p1871_p8), %s1568_s15, 4294966784  ;;  %p20_p5 = scmp.ge.s32.totalorder %s2115_s27, 4   ;;  %s2650_s21 = smov %s2031_s22 }
0x1939   : > { %s2651_s22 = smov %s2035_s23  ;;  %s2652_s23 = smov %s2126_s30 }
0x193a   : > { %s2653_s24 = smov %s2115_s27  ;;  %22 = sbr.rel (!%p20_p5) target bundleno = 5 (0x5), region = 106 }
0x1941   :  { %1581 = vsyncpa [#allocation3], 1 }
0x1942   :  { %1583 = vsyncpa [#allocation3 + $0x1], 1 }
0x1943   :  { %1584 = vsyncpa [#allocation5], 1 }
0x1944   :  { %1586 = vsyncpa [#allocation5 + $0x1], 1 }

</bundles_post_ra>
